<compile_context>
chip_gen: v6e
topology: v6e:2x2x1
jax: 0.10.0
libtpu: 0.0.40
codegen_flags: <defaults>
</compile_context>

<pallas_src>
import jax
import jax.numpy as jnp
import numpy as np
from jax.experimental import pallas as pl
from jax.experimental.pallas import tpu as pltpu


_LANES = 128
_CHUNK = 32            # rows per register-resident chunk (4 f32 vregs / value)
_ROWS_PER_TILE = 512   # (3, 512, 128) f32 block = 768 KiB


def _round_up(x, m):
    return ((x + m - 1) // m) * m


# ----------------------------------------------------------------------------
# Kernel 1: weight estimation net (three 1x1 convs == matmuls + PReLU).
# w3 is pre-padded to 128 output lanes so the final store is lane-dense; the
# padded (B, 128) result is consumed directly by kernel 2.
# ----------------------------------------------------------------------------
def weight_mlp_kernel(label_ref, w1_ref, w2_ref, w3_ref, alpha_ref, out_ref):
    a1 = alpha_ref[0]
    a2 = alpha_ref[1]
    h = jnp.dot(label_ref[...], w1_ref[...], preferred_element_type=jnp.float32)
    h = jnp.where(h > 0, h, a1 * h)                      # PReLU (single alpha)
    h = jnp.dot(h, w2_ref[...], preferred_element_type=jnp.float32)
    h = jnp.where(h > 0, h, a2 * h)                      # PReLU (single alpha)
    out_ref[...] = jnp.dot(h, w3_ref[...], preferred_element_type=jnp.float32)


# ----------------------------------------------------------------------------
# Kernel 2: fused polynomial features + per-batch (3,34) contraction via a
#           per-channel multivariate Horner evaluation on register-resident
#           32-row chunks.  The 34-channel feature tensor never exists.
# ----------------------------------------------------------------------------
def _horner_rgb(r, g, b, w):
    """Evaluate sum_k w[k] * monomial_k(r,g,b) for one output channel.

    w is the list of 34 SMEM scalars (index k matches the PyTorch feature
    ordering).  Monomials are grouped by the power of r, then g, then b.
    34 scalar-mul + 33 scalar-add vector ops per chunk.
    """
    # ---- r^0 terms ----
    q00 = b * (w[2] + b * (w[5] + b * (w[11] + b * w[21])))        # b..b^4
    q01 = w[1] + b * (w[7] + b * (w[13] + b * w[27]))              # g * (..)
    q02 = w[4] + b * (w[16] + b * w[29])                           # g^2 * (..)
    q03 = w[10] + b * w[25]                                        # g^3 * (..)
    p0 = q00 + g * (q01 + g * (q02 + g * (q03 + g * w[20])))

    # ---- r^1 terms ----
    q10 = w[0] + b * (w[8] + b * (w[14] + b * w[26]))
    q11 = w[6] + b * (w[18] + b * w[33])
    q12 = w[12] + b * w[32]
    p1 = q10 + g * (q11 + g * (q12 + g * w[24]))

    # ---- r^2 terms ----
    q20 = w[3] + b * (w[17] + b * w[30])
    q21 = w[15] + b * w[31]
    p2 = q20 + g * (q21 + g * w[28])

    # ---- r^3 / r^4 terms ----
    p3 = (w[9] + b * w[23]) + g * w[22]

    return p0 + r * (p1 + r * (p2 + r * (p3 + r * w[19])))


def poly_horner_kernel(w_ref, rgb_ref, out_ref):
    # w_ref:   (B, 128) f32 in SMEM; lanes [0, 102) hold weight[c*34 + k].
    # rgb_ref: (3, ROWS, 128) f32 VMEM block.
    # out_ref: (3, ROWS, 128) f32 VMEM block.
    bi = pl.program_id(0)
    rows = out_ref.shape[1]
    n_chunks = rows // _CHUNK        # ROWS is a multiple of _CHUNK by construction

    # Hoist the 102 SMEM scalar reads out of the chunk loop.
    w = [[w_ref[bi, c * 34 + k] for k in range(34)] for c in range(3)]

    def chunk_body(i, carry):
        i0 = pl.multiple_of(i * _CHUNK, _CHUNK)
        sl = pl.ds(i0, _CHUNK)
        r = rgb_ref[0, sl, :]
        g = rgb_ref[1, sl, :]
        b = rgb_ref[2, sl, :]
        for c in range(3):
            out_ref[c, sl, :] = _horner_rgb(r, g, b, w[c])
        return carry

    jax.lax.fori_loop(0, n_chunks, chunk_body, 0)


# ----------------------------------------------------------------------------
# Params / wrapper
# ----------------------------------------------------------------------------
def init_params(key):
    k1, k2, k3 = jax.random.split(key, 3)
    # conv weights stored as (Cin, Cout) matmul matrices
    w1 = jax.random.normal(k1, (10, 128), jnp.float32) / np.sqrt(10.0)
    w2 = jax.random.normal(k2, (128, 256), jnp.float32) / np.sqrt(128.0)
    w3 = jax.random.normal(k3, (256, 34 * 3), jnp.float32) / np.sqrt(256.0)
    alphas = jnp.array([0.25, 0.25], jnp.float32)        # PReLU default init
    return dict(w1=w1, w2=w2, w3=w3, alphas=alphas)


@jax.jit
def color_temp_tuning_forward(source, target, source_rgb, params):
    B = source.shape[0]
    _, C, H, W = source_rgb.shape
    assert C == 3
    HW = H * W

    # glue: one-hot labels (== scatter_(dim=1, value=1) in the PyTorch code)
    label = jnp.concatenate(
        [jax.nn.one_hot(source, 5, dtype=jnp.float32),
         jax.nn.one_hot(target, 5, dtype=jnp.float32)], axis=1)       # (B, 10)

    # --- kernel 1: weight estimation MLP (output padded to 128 lanes) ---
    w3_pad = jnp.pad(params["w3"],
                     ((0, 0), (0, _LANES - params["w3"].shape[1])))   # (256,128)
    weight_pad = pl.pallas_call(
        weight_mlp_kernel,
        out_shape=jax.ShapeDtypeStruct((B, _LANES), jnp.float32),
        in_specs=[
            pl.BlockSpec(memory_space=pltpu.MemorySpace.VMEM),        # label
            pl.BlockSpec(memory_space=pltpu.MemorySpace.VMEM),        # w1
            pl.BlockSpec(memory_space=pltpu.MemorySpace.VMEM),        # w2
            pl.BlockSpec(memory_space=pltpu.MemorySpace.VMEM),        # w3 (padded)
            pl.BlockSpec(memory_space=pltpu.MemorySpace.SMEM),        # alphas
        ],
        out_specs=pl.BlockSpec(memory_space=pltpu.MemorySpace.VMEM),
    )(label, params["w1"], params["w2"], w3_pad, params["alphas"])
    # weight_pad (B, 128) goes straight to kernel 2 (only lanes 0..101 read).

    # --- layout: lane-dense (rows, 128) slab; zero-copy when HW % 128 == 0 ---
    rows = -(-HW // _LANES)                      # cdiv(HW, 128)
    lane_pad = rows * _LANES - HW

    rgb_flat = source_rgb.reshape(B, 3, HW)
    if lane_pad:
        # Only when HW % 128 != 0 (pad < 128 elements per (b, c) row).
        rgb_flat = jnp.pad(rgb_flat, ((0, 0), (0, 0), (0, lane_pad)))
    rgb4 = rgb_flat.reshape(B, 3, rows, _LANES)

    rows_per_tile = min(_ROWS_PER_TILE, _round_up(rows, _CHUNK))
    n_tiles = -(-rows // rows_per_tile)
    if B * n_tiles < 2 and rows > _CHUNK:
        # v7x has 2 TensorCores: make sure the parallel grid has >= 2 entries.
        rows_per_tile = _round_up(-(-rows // 2), _CHUNK)
        n_tiles = -(-rows // rows_per_tile)

    # --- kernel 2: fused polynomial Horner evaluation ---
    blk = (pl.Squeezed(), 3, rows_per_tile, _LANES)
    out4 = pl.pallas_call(
        poly_horner_kernel,
        out_shape=jax.ShapeDtypeStruct((B, 3, rows, _LANES), jnp.float32),
        grid=(B, n_tiles),
        in_specs=[
            pl.BlockSpec(memory_space=pltpu.MemorySpace.SMEM),        # weights
            pl.BlockSpec(blk, lambda bi, t: (bi, 0, t, 0)),           # rgb tile
        ],
        out_specs=pl.BlockSpec(blk, lambda bi, t: (bi, 0, t, 0)),
        compiler_params=pltpu.CompilerParams(
            dimension_semantics=("parallel", "parallel")),
    )(weight_pad, rgb4)

    if lane_pad:
        out = out4.reshape(B, 3, rows * _LANES)[:, :, :HW]
        return out.reshape(B, 3, H, W)
    return out4.reshape(B, 3, H, W)               # zero-copy fast path


# ----------------------------------------------------------------------------
# Pure-JAX reference (sanity check)
# ----------------------------------------------------------------------------
def reference_forward(source, target, source_rgb, params):
    B = source.shape[0]
    _, _, H, W = source_rgb.shape
    label = jnp.concatenate(
        [jax.nn.one_hot(source, 5, dtype=jnp.float32),
         jax.nn.one_hot(target, 5, dtype=jnp.float32)], axis=1)
    a1, a2 = params["alphas"][0], params["alphas"][1]
    h = label @ params["w1"]
    h = jnp.where(h > 0, h, a1 * h)
    h = h @ params["w2"]
    h = jnp.where(h > 0, h, a2 * h)
    weight = (h @ params["w3"]).reshape(B, 3, 34)

    r = source_rgb[:, 0:1]
    g = source_rgb[:, 1:2]
    b = source_rgb[:, 2:3]
    feats = [
        r, g, b, r * r, g * g, b * b, r * g, g * b, r * b,
        r ** 3, g ** 3, b ** 3, r * g * g, g * b * b, r * b * b,
        g * r * r, b * g * g, b * r * r, r * g * b,
        r ** 4, g ** 4, b ** 4, r ** 3 * g, r ** 3 * b, g ** 3 * r,
        g ** 3 * b, b ** 3 * r, b ** 3 * g, r ** 2 * g ** 2,
        g ** 2 * b ** 2, r ** 2 * b ** 2, r ** 2 * g * b,
        g ** 2 * r * b, b ** 2 * r * g,
    ]
    phi = jnp.concatenate(feats, axis=1).reshape(B, 34, H * W)
    out = jnp.einsum("bck,bkn->bcn", weight, phi)
    return out.reshape(B, 3, H, W)


if __name__ == "__main__":
    key = jax.random.PRNGKey(0)
    k_p, k_s, k_t, k_rgb = jax.random.split(key, 4)

    B, H, W = 2, 16, 16
    params = init_params(k_p)
    source = jax.random.randint(k_s, (B,), 0, 5, dtype=jnp.int32)
    target = jax.random.randint(k_t, (B,), 0, 5, dtype=jnp.int32)
    source_rgb = jax.random.uniform(k_rgb, (B, 3, H, W), jnp.float32)

    out = color_temp_tuning_forward(source, target, source_rgb, params)
    out = jax.block_until_ready(out)

    ref = jax.block_until_ready(
        reference_forward(source, target, source_rgb, params))

    assert out.shape == (B, 3, H, W)
    np.testing.assert_allclose(np.asarray(out), np.asarray(ref),
                               rtol=1e-2, atol=1e-2)
    print("KERNEL_OK")
</pallas_src>

<mosaic_0001>
module attributes {stable_mosaic.version = 11 : i64} {
  func.func @weight_mlp_kernel(%arg0: memref<2x10xf32, #tpu.memory_space<vmem>>, %arg1: memref<10x128xf32, #tpu.memory_space<vmem>>, %arg2: memref<128x256xf32, #tpu.memory_space<vmem>>, %arg3: memref<256x128xf32, #tpu.memory_space<vmem>>, %arg4: memref<2xf32, #tpu.memory_space<smem>>, %arg5: memref<2x128xf32, #tpu.memory_space<vmem>>) attributes {dimension_semantics = [], scalar_prefetch = 0 : i64, scratch_operands = 0 : i64, tpu.core_type = #tpu.core_type<tc>} {
    %c0 = arith.constant 0 : index
    %0 = memref.load %arg4[%c0] : memref<2xf32, #tpu.memory_space<smem>>
    %c1 = arith.constant 1 : index
    %1 = memref.load %arg4[%c1] : memref<2xf32, #tpu.memory_space<smem>>
    %c0_0 = arith.constant 0 : index
    %c0_1 = arith.constant 0 : index
    %2 = vector.load %arg0[%c0_0, %c0_1] : memref<2x10xf32, #tpu.memory_space<vmem>>, vector<2x10xf32>
    %c0_2 = arith.constant 0 : index
    %c0_3 = arith.constant 0 : index
    %3 = vector.load %arg1[%c0_2, %c0_3] : memref<10x128xf32, #tpu.memory_space<vmem>>, vector<10x128xf32>
    %cst = arith.constant dense<0.000000e+00> : vector<2x128xf32>
    %4 = tpu.matmul %2, %3, %cst {dimension_numbers = #tpu.dot_dimension_numbers<[1], [0], [0], [1], [0, 0, 1, 1], [], []>} : vector<2x10xf32>, vector<10x128xf32>, vector<2x128xf32> -> vector<2x128xf32>
    %cst_4 = arith.constant 0.000000e+00 : f32
    %5 = vector.broadcast %cst_4 : f32 to vector<2x128xf32>
    %6 = arith.cmpf ogt, %4, %5 : vector<2x128xf32>
    %7 = vector.broadcast %0 : f32 to vector<2x128xf32>
    %8 = arith.mulf %7, %4 : vector<2x128xf32>
    %9 = arith.select %6, %4, %8 : vector<2x128xi1>, vector<2x128xf32>
    %c0_5 = arith.constant 0 : index
    %c0_6 = arith.constant 0 : index
    %10 = vector.load %arg2[%c0_5, %c0_6] : memref<128x256xf32, #tpu.memory_space<vmem>>, vector<128x256xf32>
    %cst_7 = arith.constant dense<0.000000e+00> : vector<2x256xf32>
    %11 = tpu.matmul %9, %10, %cst_7 {dimension_numbers = #tpu.dot_dimension_numbers<[1], [0], [0], [1], [0, 0, 1, 1], [], []>} : vector<2x128xf32>, vector<128x256xf32>, vector<2x256xf32> -> vector<2x256xf32>
    %cst_8 = arith.constant 0.000000e+00 : f32
    %12 = vector.broadcast %cst_8 : f32 to vector<2x256xf32>
    %13 = arith.cmpf ogt, %11, %12 : vector<2x256xf32>
    %14 = vector.broadcast %1 : f32 to vector<2x256xf32>
    %15 = arith.mulf %14, %11 : vector<2x256xf32>
    %16 = arith.select %13, %11, %15 : vector<2x256xi1>, vector<2x256xf32>
    %c0_9 = arith.constant 0 : index
    %c0_10 = arith.constant 0 : index
    %17 = vector.load %arg3[%c0_9, %c0_10] : memref<256x128xf32, #tpu.memory_space<vmem>>, vector<256x128xf32>
    %cst_11 = arith.constant dense<0.000000e+00> : vector<2x128xf32>
    %18 = tpu.matmul %16, %17, %cst_11 {dimension_numbers = #tpu.dot_dimension_numbers<[1], [0], [0], [1], [0, 0, 1, 1], [], []>} : vector<2x256xf32>, vector<256x128xf32>, vector<2x128xf32> -> vector<2x128xf32>
    %c0_12 = arith.constant 0 : index
    %c0_13 = arith.constant 0 : index
    %19 = vector.load %arg5[%c0_12, %c0_13] : memref<2x128xf32, #tpu.memory_space<vmem>>, vector<2x128xf32>
    tpu.vector_store %arg5[%c0_12, %c0_13], %18 {strides = array<i32>} : memref<2x128xf32, #tpu.memory_space<vmem>>, vector<2x128xf32>,
    return
  }
}

module attributes {stable_mosaic.version = 11 : i64} {
  func.func @poly_horner_kernel(%arg0: i32, %arg1: i32, %arg2: memref<2x128xf32, #tpu.memory_space<smem>>, %arg3: memref<1x3x32x128xf32, #tpu.memory_space<vmem>>, %arg4: memref<1x3x32x128xf32, #tpu.memory_space<vmem>>) attributes {dimension_semantics = [#tpu.dimension_semantics<parallel>, #tpu.dimension_semantics<parallel>], iteration_bounds = array<i64: 2, 1>, scalar_prefetch = 0 : i64, scratch_operands = 0 : i64, tpu.core_type = #tpu.core_type<tc>, window_params = [{transform_indices = @transform_0, window_bounds = array<i64: 2, 128>}, {transform_indices = @transform_1, window_bounds = array<i64: 1, 3, 32, 128>}, {transform_indices = @transform_2, window_bounds = array<i64: 1, 3, 32, 128>}]} {
    %0 = arith.index_cast %arg0 : i32 to index
    %c0 = arith.constant 0 : index
    %1 = memref.load %arg2[%0, %c0] : memref<2x128xf32, #tpu.memory_space<smem>>
    %2 = arith.index_cast %arg0 : i32 to index
    %c1 = arith.constant 1 : index
    %3 = memref.load %arg2[%2, %c1] : memref<2x128xf32, #tpu.memory_space<smem>>
    %4 = arith.index_cast %arg0 : i32 to index
    %c2 = arith.constant 2 : index
    %5 = memref.load %arg2[%4, %c2] : memref<2x128xf32, #tpu.memory_space<smem>>
    %6 = arith.index_cast %arg0 : i32 to index
    %c3 = arith.constant 3 : index
    %7 = memref.load %arg2[%6, %c3] : memref<2x128xf32, #tpu.memory_space<smem>>
    %8 = arith.index_cast %arg0 : i32 to index
    %c4 = arith.constant 4 : index
    %9 = memref.load %arg2[%8, %c4] : memref<2x128xf32, #tpu.memory_space<smem>>
    %10 = arith.index_cast %arg0 : i32 to index
    %c5 = arith.constant 5 : index
    %11 = memref.load %arg2[%10, %c5] : memref<2x128xf32, #tpu.memory_space<smem>>
    %12 = arith.index_cast %arg0 : i32 to index
    %c6 = arith.constant 6 : index
    %13 = memref.load %arg2[%12, %c6] : memref<2x128xf32, #tpu.memory_space<smem>>
    %14 = arith.index_cast %arg0 : i32 to index
    %c7 = arith.constant 7 : index
    %15 = memref.load %arg2[%14, %c7] : memref<2x128xf32, #tpu.memory_space<smem>>
    %16 = arith.index_cast %arg0 : i32 to index
    %c8 = arith.constant 8 : index
    %17 = memref.load %arg2[%16, %c8] : memref<2x128xf32, #tpu.memory_space<smem>>
    %18 = arith.index_cast %arg0 : i32 to index
    %c9 = arith.constant 9 : index
    %19 = memref.load %arg2[%18, %c9] : memref<2x128xf32, #tpu.memory_space<smem>>
    %20 = arith.index_cast %arg0 : i32 to index
    %c10 = arith.constant 10 : index
    %21 = memref.load %arg2[%20, %c10] : memref<2x128xf32, #tpu.memory_space<smem>>
    %22 = arith.index_cast %arg0 : i32 to index
    %c11 = arith.constant 11 : index
    %23 = memref.load %arg2[%22, %c11] : memref<2x128xf32, #tpu.memory_space<smem>>
    %24 = arith.index_cast %arg0 : i32 to index
    %c12 = arith.constant 12 : index
    %25 = memref.load %arg2[%24, %c12] : memref<2x128xf32, #tpu.memory_space<smem>>
    %26 = arith.index_cast %arg0 : i32 to index
    %c13 = arith.constant 13 : index
    %27 = memref.load %arg2[%26, %c13] : memref<2x128xf32, #tpu.memory_space<smem>>
    %28 = arith.index_cast %arg0 : i32 to index
    %c14 = arith.constant 14 : index
    %29 = memref.load %arg2[%28, %c14] : memref<2x128xf32, #tpu.memory_space<smem>>
    %30 = arith.index_cast %arg0 : i32 to index
    %c15 = arith.constant 15 : index
    %31 = memref.load %arg2[%30, %c15] : memref<2x128xf32, #tpu.memory_space<smem>>
    %32 = arith.index_cast %arg0 : i32 to index
    %c16 = arith.constant 16 : index
    %33 = memref.load %arg2[%32, %c16] : memref<2x128xf32, #tpu.memory_space<smem>>
    %34 = arith.index_cast %arg0 : i32 to index
    %c17 = arith.constant 17 : index
    %35 = memref.load %arg2[%34, %c17] : memref<2x128xf32, #tpu.memory_space<smem>>
    %36 = arith.index_cast %arg0 : i32 to index
    %c18 = arith.constant 18 : index
    %37 = memref.load %arg2[%36, %c18] : memref<2x128xf32, #tpu.memory_space<smem>>
    %38 = arith.index_cast %arg0 : i32 to index
    %c19 = arith.constant 19 : index
    %39 = memref.load %arg2[%38, %c19] : memref<2x128xf32, #tpu.memory_space<smem>>
    %40 = arith.index_cast %arg0 : i32 to index
    %c20 = arith.constant 20 : index
    %41 = memref.load %arg2[%40, %c20] : memref<2x128xf32, #tpu.memory_space<smem>>
    %42 = arith.index_cast %arg0 : i32 to index
    %c21 = arith.constant 21 : index
    %43 = memref.load %arg2[%42, %c21] : memref<2x128xf32, #tpu.memory_space<smem>>
    %44 = arith.index_cast %arg0 : i32 to index
    %c22 = arith.constant 22 : index
    %45 = memref.load %arg2[%44, %c22] : memref<2x128xf32, #tpu.memory_space<smem>>
    %46 = arith.index_cast %arg0 : i32 to index
    %c23 = arith.constant 23 : index
    %47 = memref.load %arg2[%46, %c23] : memref<2x128xf32, #tpu.memory_space<smem>>
    %48 = arith.index_cast %arg0 : i32 to index
    %c24 = arith.constant 24 : index
    %49 = memref.load %arg2[%48, %c24] : memref<2x128xf32, #tpu.memory_space<smem>>
    %50 = arith.index_cast %arg0 : i32 to index
    %c25 = arith.constant 25 : index
    %51 = memref.load %arg2[%50, %c25] : memref<2x128xf32, #tpu.memory_space<smem>>
    %52 = arith.index_cast %arg0 : i32 to index
    %c26 = arith.constant 26 : index
    %53 = memref.load %arg2[%52, %c26] : memref<2x128xf32, #tpu.memory_space<smem>>
    %54 = arith.index_cast %arg0 : i32 to index
    %c27 = arith.constant 27 : index
    %55 = memref.load %arg2[%54, %c27] : memref<2x128xf32, #tpu.memory_space<smem>>
    %56 = arith.index_cast %arg0 : i32 to index
    %c28 = arith.constant 28 : index
    %57 = memref.load %arg2[%56, %c28] : memref<2x128xf32, #tpu.memory_space<smem>>
    %58 = arith.index_cast %arg0 : i32 to index
    %c29 = arith.constant 29 : index
    %59 = memref.load %arg2[%58, %c29] : memref<2x128xf32, #tpu.memory_space<smem>>
    %60 = arith.index_cast %arg0 : i32 to index
    %c30 = arith.constant 30 : index
    %61 = memref.load %arg2[%60, %c30] : memref<2x128xf32, #tpu.memory_space<smem>>
    %62 = arith.index_cast %arg0 : i32 to index
    %c31 = arith.constant 31 : index
    %63 = memref.load %arg2[%62, %c31] : memref<2x128xf32, #tpu.memory_space<smem>>
    %64 = arith.index_cast %arg0 : i32 to index
    %c32 = arith.constant 32 : index
    %65 = memref.load %arg2[%64, %c32] : memref<2x128xf32, #tpu.memory_space<smem>>
    %66 = arith.index_cast %arg0 : i32 to index
    %c33 = arith.constant 33 : index
    %67 = memref.load %arg2[%66, %c33] : memref<2x128xf32, #tpu.memory_space<smem>>
    %68 = arith.index_cast %arg0 : i32 to index
    %c34 = arith.constant 34 : index
    %69 = memref.load %arg2[%68, %c34] : memref<2x128xf32, #tpu.memory_space<smem>>
    %70 = arith.index_cast %arg0 : i32 to index
    %c35 = arith.constant 35 : index
    %71 = memref.load %arg2[%70, %c35] : memref<2x128xf32, #tpu.memory_space<smem>>
    %72 = arith.index_cast %arg0 : i32 to index
    %c36 = arith.constant 36 : index
    %73 = memref.load %arg2[%72, %c36] : memref<2x128xf32, #tpu.memory_space<smem>>
    %74 = arith.index_cast %arg0 : i32 to index
    %c37 = arith.constant 37 : index
    %75 = memref.load %arg2[%74, %c37] : memref<2x128xf32, #tpu.memory_space<smem>>
    %76 = arith.index_cast %arg0 : i32 to index
    %c38 = arith.constant 38 : index
    %77 = memref.load %arg2[%76, %c38] : memref<2x128xf32, #tpu.memory_space<smem>>
    %78 = arith.index_cast %arg0 : i32 to index
    %c39 = arith.constant 39 : index
    %79 = memref.load %arg2[%78, %c39] : memref<2x128xf32, #tpu.memory_space<smem>>
    %80 = arith.index_cast %arg0 : i32 to index
    %c40 = arith.constant 40 : index
    %81 = memref.load %arg2[%80, %c40] : memref<2x128xf32, #tpu.memory_space<smem>>
    %82 = arith.index_cast %arg0 : i32 to index
    %c41 = arith.constant 41 : index
    %83 = memref.load %arg2[%82, %c41] : memref<2x128xf32, #tpu.memory_space<smem>>
    %84 = arith.index_cast %arg0 : i32 to index
    %c42 = arith.constant 42 : index
    %85 = memref.load %arg2[%84, %c42] : memref<2x128xf32, #tpu.memory_space<smem>>
    %86 = arith.index_cast %arg0 : i32 to index
    %c43 = arith.constant 43 : index
    %87 = memref.load %arg2[%86, %c43] : memref<2x128xf32, #tpu.memory_space<smem>>
    %88 = arith.index_cast %arg0 : i32 to index
    %c44 = arith.constant 44 : index
    %89 = memref.load %arg2[%88, %c44] : memref<2x128xf32, #tpu.memory_space<smem>>
    %90 = arith.index_cast %arg0 : i32 to index
    %c45 = arith.constant 45 : index
    %91 = memref.load %arg2[%90, %c45] : memref<2x128xf32, #tpu.memory_space<smem>>
    %92 = arith.index_cast %arg0 : i32 to index
    %c46 = arith.constant 46 : index
    %93 = memref.load %arg2[%92, %c46] : memref<2x128xf32, #tpu.memory_space<smem>>
    %94 = arith.index_cast %arg0 : i32 to index
    %c47 = arith.constant 47 : index
    %95 = memref.load %arg2[%94, %c47] : memref<2x128xf32, #tpu.memory_space<smem>>
    %96 = arith.index_cast %arg0 : i32 to index
    %c48 = arith.constant 48 : index
    %97 = memref.load %arg2[%96, %c48] : memref<2x128xf32, #tpu.memory_space<smem>>
    %98 = arith.index_cast %arg0 : i32 to index
    %c49 = arith.constant 49 : index
    %99 = memref.load %arg2[%98, %c49] : memref<2x128xf32, #tpu.memory_space<smem>>
    %100 = arith.index_cast %arg0 : i32 to index
    %c50 = arith.constant 50 : index
    %101 = memref.load %arg2[%100, %c50] : memref<2x128xf32, #tpu.memory_space<smem>>
    %102 = arith.index_cast %arg0 : i32 to index
    %c51 = arith.constant 51 : index
    %103 = memref.load %arg2[%102, %c51] : memref<2x128xf32, #tpu.memory_space<smem>>
    %104 = arith.index_cast %arg0 : i32 to index
    %c52 = arith.constant 52 : index
    %105 = memref.load %arg2[%104, %c52] : memref<2x128xf32, #tpu.memory_space<smem>>
    %106 = arith.index_cast %arg0 : i32 to index
    %c53 = arith.constant 53 : index
    %107 = memref.load %arg2[%106, %c53] : memref<2x128xf32, #tpu.memory_space<smem>>
    %108 = arith.index_cast %arg0 : i32 to index
    %c54 = arith.constant 54 : index
    %109 = memref.load %arg2[%108, %c54] : memref<2x128xf32, #tpu.memory_space<smem>>
    %110 = arith.index_cast %arg0 : i32 to index
    %c55 = arith.constant 55 : index
    %111 = memref.load %arg2[%110, %c55] : memref<2x128xf32, #tpu.memory_space<smem>>
    %112 = arith.index_cast %arg0 : i32 to index
    %c56 = arith.constant 56 : index
    %113 = memref.load %arg2[%112, %c56] : memref<2x128xf32, #tpu.memory_space<smem>>
    %114 = arith.index_cast %arg0 : i32 to index
    %c57 = arith.constant 57 : index
    %115 = memref.load %arg2[%114, %c57] : memref<2x128xf32, #tpu.memory_space<smem>>
    %116 = arith.index_cast %arg0 : i32 to index
    %c58 = arith.constant 58 : index
    %117 = memref.load %arg2[%116, %c58] : memref<2x128xf32, #tpu.memory_space<smem>>
    %118 = arith.index_cast %arg0 : i32 to index
    %c59 = arith.constant 59 : index
    %119 = memref.load %arg2[%118, %c59] : memref<2x128xf32, #tpu.memory_space<smem>>
    %120 = arith.index_cast %arg0 : i32 to index
    %c60 = arith.constant 60 : index
    %121 = memref.load %arg2[%120, %c60] : memref<2x128xf32, #tpu.memory_space<smem>>
    %122 = arith.index_cast %arg0 : i32 to index
    %c61 = arith.constant 61 : index
    %123 = memref.load %arg2[%122, %c61] : memref<2x128xf32, #tpu.memory_space<smem>>
    %124 = arith.index_cast %arg0 : i32 to index
    %c62 = arith.constant 62 : index
    %125 = memref.load %arg2[%124, %c62] : memref<2x128xf32, #tpu.memory_space<smem>>
    %126 = arith.index_cast %arg0 : i32 to index
    %c63 = arith.constant 63 : index
    %127 = memref.load %arg2[%126, %c63] : memref<2x128xf32, #tpu.memory_space<smem>>
    %128 = arith.index_cast %arg0 : i32 to index
    %c64 = arith.constant 64 : index
    %129 = memref.load %arg2[%128, %c64] : memref<2x128xf32, #tpu.memory_space<smem>>
    %130 = arith.index_cast %arg0 : i32 to index
    %c65 = arith.constant 65 : index
    %131 = memref.load %arg2[%130, %c65] : memref<2x128xf32, #tpu.memory_space<smem>>
    %132 = arith.index_cast %arg0 : i32 to index
    %c66 = arith.constant 66 : index
    %133 = memref.load %arg2[%132, %c66] : memref<2x128xf32, #tpu.memory_space<smem>>
    %134 = arith.index_cast %arg0 : i32 to index
    %c67 = arith.constant 67 : index
    %135 = memref.load %arg2[%134, %c67] : memref<2x128xf32, #tpu.memory_space<smem>>
    %136 = arith.index_cast %arg0 : i32 to index
    %c68 = arith.constant 68 : index
    %137 = memref.load %arg2[%136, %c68] : memref<2x128xf32, #tpu.memory_space<smem>>
    %138 = arith.index_cast %arg0 : i32 to index
    %c69 = arith.constant 69 : index
    %139 = memref.load %arg2[%138, %c69] : memref<2x128xf32, #tpu.memory_space<smem>>
    %140 = arith.index_cast %arg0 : i32 to index
    %c70 = arith.constant 70 : index
    %141 = memref.load %arg2[%140, %c70] : memref<2x128xf32, #tpu.memory_space<smem>>
    %142 = arith.index_cast %arg0 : i32 to index
    %c71 = arith.constant 71 : index
    %143 = memref.load %arg2[%142, %c71] : memref<2x128xf32, #tpu.memory_space<smem>>
    %144 = arith.index_cast %arg0 : i32 to index
    %c72 = arith.constant 72 : index
    %145 = memref.load %arg2[%144, %c72] : memref<2x128xf32, #tpu.memory_space<smem>>
    %146 = arith.index_cast %arg0 : i32 to index
    %c73 = arith.constant 73 : index
    %147 = memref.load %arg2[%146, %c73] : memref<2x128xf32, #tpu.memory_space<smem>>
    %148 = arith.index_cast %arg0 : i32 to index
    %c74 = arith.constant 74 : index
    %149 = memref.load %arg2[%148, %c74] : memref<2x128xf32, #tpu.memory_space<smem>>
    %150 = arith.index_cast %arg0 : i32 to index
    %c75 = arith.constant 75 : index
    %151 = memref.load %arg2[%150, %c75] : memref<2x128xf32, #tpu.memory_space<smem>>
    %152 = arith.index_cast %arg0 : i32 to index
    %c76 = arith.constant 76 : index
    %153 = memref.load %arg2[%152, %c76] : memref<2x128xf32, #tpu.memory_space<smem>>
    %154 = arith.index_cast %arg0 : i32 to index
    %c77 = arith.constant 77 : index
    %155 = memref.load %arg2[%154, %c77] : memref<2x128xf32, #tpu.memory_space<smem>>
    %156 = arith.index_cast %arg0 : i32 to index
    %c78 = arith.constant 78 : index
    %157 = memref.load %arg2[%156, %c78] : memref<2x128xf32, #tpu.memory_space<smem>>
    %158 = arith.index_cast %arg0 : i32 to index
    %c79 = arith.constant 79 : index
    %159 = memref.load %arg2[%158, %c79] : memref<2x128xf32, #tpu.memory_space<smem>>
    %160 = arith.index_cast %arg0 : i32 to index
    %c80 = arith.constant 80 : index
    %161 = memref.load %arg2[%160, %c80] : memref<2x128xf32, #tpu.memory_space<smem>>
    %162 = arith.index_cast %arg0 : i32 to index
    %c81 = arith.constant 81 : index
    %163 = memref.load %arg2[%162, %c81] : memref<2x128xf32, #tpu.memory_space<smem>>
    %164 = arith.index_cast %arg0 : i32 to index
    %c82 = arith.constant 82 : index
    %165 = memref.load %arg2[%164, %c82] : memref<2x128xf32, #tpu.memory_space<smem>>
    %166 = arith.index_cast %arg0 : i32 to index
    %c83 = arith.constant 83 : index
    %167 = memref.load %arg2[%166, %c83] : memref<2x128xf32, #tpu.memory_space<smem>>
    %168 = arith.index_cast %arg0 : i32 to index
    %c84 = arith.constant 84 : index
    %169 = memref.load %arg2[%168, %c84] : memref<2x128xf32, #tpu.memory_space<smem>>
    %170 = arith.index_cast %arg0 : i32 to index
    %c85 = arith.constant 85 : index
    %171 = memref.load %arg2[%170, %c85] : memref<2x128xf32, #tpu.memory_space<smem>>
    %172 = arith.index_cast %arg0 : i32 to index
    %c86 = arith.constant 86 : index
    %173 = memref.load %arg2[%172, %c86] : memref<2x128xf32, #tpu.memory_space<smem>>
    %174 = arith.index_cast %arg0 : i32 to index
    %c87 = arith.constant 87 : index
    %175 = memref.load %arg2[%174, %c87] : memref<2x128xf32, #tpu.memory_space<smem>>
    %176 = arith.index_cast %arg0 : i32 to index
    %c88 = arith.constant 88 : index
    %177 = memref.load %arg2[%176, %c88] : memref<2x128xf32, #tpu.memory_space<smem>>
    %178 = arith.index_cast %arg0 : i32 to index
    %c89 = arith.constant 89 : index
    %179 = memref.load %arg2[%178, %c89] : memref<2x128xf32, #tpu.memory_space<smem>>
    %180 = arith.index_cast %arg0 : i32 to index
    %c90 = arith.constant 90 : index
    %181 = memref.load %arg2[%180, %c90] : memref<2x128xf32, #tpu.memory_space<smem>>
    %182 = arith.index_cast %arg0 : i32 to index
    %c91 = arith.constant 91 : index
    %183 = memref.load %arg2[%182, %c91] : memref<2x128xf32, #tpu.memory_space<smem>>
    %184 = arith.index_cast %arg0 : i32 to index
    %c92 = arith.constant 92 : index
    %185 = memref.load %arg2[%184, %c92] : memref<2x128xf32, #tpu.memory_space<smem>>
    %186 = arith.index_cast %arg0 : i32 to index
    %c93 = arith.constant 93 : index
    %187 = memref.load %arg2[%186, %c93] : memref<2x128xf32, #tpu.memory_space<smem>>
    %188 = arith.index_cast %arg0 : i32 to index
    %c94 = arith.constant 94 : index
    %189 = memref.load %arg2[%188, %c94] : memref<2x128xf32, #tpu.memory_space<smem>>
    %190 = arith.index_cast %arg0 : i32 to index
    %c95 = arith.constant 95 : index
    %191 = memref.load %arg2[%190, %c95] : memref<2x128xf32, #tpu.memory_space<smem>>
    %192 = arith.index_cast %arg0 : i32 to index
    %c96 = arith.constant 96 : index
    %193 = memref.load %arg2[%192, %c96] : memref<2x128xf32, #tpu.memory_space<smem>>
    %194 = arith.index_cast %arg0 : i32 to index
    %c97 = arith.constant 97 : index
    %195 = memref.load %arg2[%194, %c97] : memref<2x128xf32, #tpu.memory_space<smem>>
    %196 = arith.index_cast %arg0 : i32 to index
    %c98 = arith.constant 98 : index
    %197 = memref.load %arg2[%196, %c98] : memref<2x128xf32, #tpu.memory_space<smem>>
    %198 = arith.index_cast %arg0 : i32 to index
    %c99 = arith.constant 99 : index
    %199 = memref.load %arg2[%198, %c99] : memref<2x128xf32, #tpu.memory_space<smem>>
    %200 = arith.index_cast %arg0 : i32 to index
    %c100 = arith.constant 100 : index
    %201 = memref.load %arg2[%200, %c100] : memref<2x128xf32, #tpu.memory_space<smem>>
    %202 = arith.index_cast %arg0 : i32 to index
    %c101 = arith.constant 101 : index
    %203 = memref.load %arg2[%202, %c101] : memref<2x128xf32, #tpu.memory_space<smem>>
    %c0_i32 = arith.constant 0 : i32
    %c32_i32 = arith.constant 32 : i32
    %204 = arith.muli %c0_i32, %c32_i32 : i32
    %205 = tpu.assume_multiple %204, 32 : i32
    %c0_0 = arith.constant 0 : index
    %c0_1 = arith.constant 0 : index
    %206 = arith.index_cast %205 : i32 to index
    %c0_2 = arith.constant 0 : index
    %207 = vector.load %arg3[%c0_0, %c0_1, %206, %c0_2] : memref<1x3x32x128xf32, #tpu.memory_space<vmem>>, vector<1x1x32x128xf32>
    %208 = vector.shape_cast %207 : vector<1x1x32x128xf32> to vector<32x128xf32>
    %c0_3 = arith.constant 0 : index
    %c1_4 = arith.constant 1 : index
    %209 = arith.index_cast %205 : i32 to index
    %c0_5 = arith.constant 0 : index
    %210 = vector.load %arg3[%c0_3, %c1_4, %209, %c0_5] : memref<1x3x32x128xf32, #tpu.memory_space<vmem>>, vector<1x1x32x128xf32>
    %211 = vector.shape_cast %210 : vector<1x1x32x128xf32> to vector<32x128xf32>
    %c0_6 = arith.constant 0 : index
    %c2_7 = arith.constant 2 : index
    %212 = arith.index_cast %205 : i32 to index
    %c0_8 = arith.constant 0 : index
    %213 = vector.load %arg3[%c0_6, %c2_7, %212, %c0_8] : memref<1x3x32x128xf32, #tpu.memory_space<vmem>>, vector<1x1x32x128xf32>
    %214 = vector.shape_cast %213 : vector<1x1x32x128xf32> to vector<32x128xf32>
    %215 = vector.broadcast %43 : f32 to vector<32x128xf32>
    %216 = arith.mulf %214, %215 : vector<32x128xf32>
    %217 = vector.broadcast %23 : f32 to vector<32x128xf32>
    %218 = arith.addf %217, %216 : vector<32x128xf32>
    %219 = arith.mulf %214, %218 : vector<32x128xf32>
    %220 = vector.broadcast %11 : f32 to vector<32x128xf32>
    %221 = arith.addf %220, %219 : vector<32x128xf32>
    %222 = arith.mulf %214, %221 : vector<32x128xf32>
    %223 = vector.broadcast %5 : f32 to vector<32x128xf32>
    %224 = arith.addf %223, %222 : vector<32x128xf32>
    %225 = arith.mulf %214, %224 : vector<32x128xf32>
    %226 = vector.broadcast %55 : f32 to vector<32x128xf32>
    %227 = arith.mulf %214, %226 : vector<32x128xf32>
    %228 = vector.broadcast %27 : f32 to vector<32x128xf32>
    %229 = arith.addf %228, %227 : vector<32x128xf32>
    %230 = arith.mulf %214, %229 : vector<32x128xf32>
    %231 = vector.broadcast %15 : f32 to vector<32x128xf32>
    %232 = arith.addf %231, %230 : vector<32x128xf32>
    %233 = arith.mulf %214, %232 : vector<32x128xf32>
    %234 = vector.broadcast %3 : f32 to vector<32x128xf32>
    %235 = arith.addf %234, %233 : vector<32x128xf32>
    %236 = vector.broadcast %59 : f32 to vector<32x128xf32>
    %237 = arith.mulf %214, %236 : vector<32x128xf32>
    %238 = vector.broadcast %33 : f32 to vector<32x128xf32>
    %239 = arith.addf %238, %237 : vector<32x128xf32>
    %240 = arith.mulf %214, %239 : vector<32x128xf32>
    %241 = vector.broadcast %9 : f32 to vector<32x128xf32>
    %242 = arith.addf %241, %240 : vector<32x128xf32>
    %243 = vector.broadcast %51 : f32 to vector<32x128xf32>
    %244 = arith.mulf %214, %243 : vector<32x128xf32>
    %245 = vector.broadcast %21 : f32 to vector<32x128xf32>
    %246 = arith.addf %245, %244 : vector<32x128xf32>
    %247 = vector.broadcast %41 : f32 to vector<32x128xf32>
    %248 = arith.mulf %211, %247 : vector<32x128xf32>
    %249 = arith.addf %246, %248 : vector<32x128xf32>
    %250 = arith.mulf %211, %249 : vector<32x128xf32>
    %251 = arith.addf %242, %250 : vector<32x128xf32>
    %252 = arith.mulf %211, %251 : vector<32x128xf32>
    %253 = arith.addf %235, %252 : vector<32x128xf32>
    %254 = arith.mulf %211, %253 : vector<32x128xf32>
    %255 = arith.addf %225, %254 : vector<32x128xf32>
    %256 = vector.broadcast %53 : f32 to vector<32x128xf32>
    %257 = arith.mulf %214, %256 : vector<32x128xf32>
    %258 = vector.broadcast %29 : f32 to vector<32x128xf32>
    %259 = arith.addf %258, %257 : vector<32x128xf32>
    %260 = arith.mulf %214, %259 : vector<32x128xf32>
    %261 = vector.broadcast %17 : f32 to vector<32x128xf32>
    %262 = arith.addf %261, %260 : vector<32x128xf32>
    %263 = arith.mulf %214, %262 : vector<32x128xf32>
    %264 = vector.broadcast %1 : f32 to vector<32x128xf32>
    %265 = arith.addf %264, %263 : vector<32x128xf32>
    %266 = vector.broadcast %67 : f32 to vector<32x128xf32>
    %267 = arith.mulf %214, %266 : vector<32x128xf32>
    %268 = vector.broadcast %37 : f32 to vector<32x128xf32>
    %269 = arith.addf %268, %267 : vector<32x128xf32>
    %270 = arith.mulf %214, %269 : vector<32x128xf32>
    %271 = vector.broadcast %13 : f32 to vector<32x128xf32>
    %272 = arith.addf %271, %270 : vector<32x128xf32>
    %273 = vector.broadcast %65 : f32 to vector<32x128xf32>
    %274 = arith.mulf %214, %273 : vector<32x128xf32>
    %275 = vector.broadcast %25 : f32 to vector<32x128xf32>
    %276 = arith.addf %275, %274 : vector<32x128xf32>
    %277 = vector.broadcast %49 : f32 to vector<32x128xf32>
    %278 = arith.mulf %211, %277 : vector<32x128xf32>
    %279 = arith.addf %276, %278 : vector<32x128xf32>
    %280 = arith.mulf %211, %279 : vector<32x128xf32>
    %281 = arith.addf %272, %280 : vector<32x128xf32>
    %282 = arith.mulf %211, %281 : vector<32x128xf32>
    %283 = arith.addf %265, %282 : vector<32x128xf32>
    %284 = vector.broadcast %61 : f32 to vector<32x128xf32>
    %285 = arith.mulf %214, %284 : vector<32x128xf32>
    %286 = vector.broadcast %35 : f32 to vector<32x128xf32>
    %287 = arith.addf %286, %285 : vector<32x128xf32>
    %288 = arith.mulf %214, %287 : vector<32x128xf32>
    %289 = vector.broadcast %7 : f32 to vector<32x128xf32>
    %290 = arith.addf %289, %288 : vector<32x128xf32>
    %291 = vector.broadcast %63 : f32 to vector<32x128xf32>
    %292 = arith.mulf %214, %291 : vector<32x128xf32>
    %293 = vector.broadcast %31 : f32 to vector<32x128xf32>
    %294 = arith.addf %293, %292 : vector<32x128xf32>
    %295 = vector.broadcast %57 : f32 to vector<32x128xf32>
    %296 = arith.mulf %211, %295 : vector<32x128xf32>
    %297 = arith.addf %294, %296 : vector<32x128xf32>
    %298 = arith.mulf %211, %297 : vector<32x128xf32>
    %299 = arith.addf %290, %298 : vector<32x128xf32>
    %300 = vector.broadcast %47 : f32 to vector<32x128xf32>
    %301 = arith.mulf %214, %300 : vector<32x128xf32>
    %302 = vector.broadcast %19 : f32 to vector<32x128xf32>
    %303 = arith.addf %302, %301 : vector<32x128xf32>
    %304 = vector.broadcast %45 : f32 to vector<32x128xf32>
    %305 = arith.mulf %211, %304 : vector<32x128xf32>
    %306 = arith.addf %303, %305 : vector<32x128xf32>
    %307 = vector.broadcast %39 : f32 to vector<32x128xf32>
    %308 = arith.mulf %208, %307 : vector<32x128xf32>
    %309 = arith.addf %306, %308 : vector<32x128xf32>
    %310 = arith.mulf %208, %309 : vector<32x128xf32>
    %311 = arith.addf %299, %310 : vector<32x128xf32>
    %312 = arith.mulf %208, %311 : vector<32x128xf32>
    %313 = arith.addf %283, %312 : vector<32x128xf32>
    %314 = arith.mulf %208, %313 : vector<32x128xf32>
    %315 = arith.addf %255, %314 : vector<32x128xf32>
    %c0_9 = arith.constant 0 : index
    %c0_10 = arith.constant 0 : index
    %316 = arith.index_cast %205 : i32 to index
    %c0_11 = arith.constant 0 : index
    %317 = vector.load %arg4[%c0_9, %c0_10, %316, %c0_11] : memref<1x3x32x128xf32, #tpu.memory_space<vmem>>, vector<1x1x32x128xf32>
    %318 = vector.shape_cast %317 : vector<1x1x32x128xf32> to vector<32x128xf32>
    %319 = vector.shape_cast %315 : vector<32x128xf32> to vector<1x1x32x128xf32>
    tpu.vector_store %arg4[%c0_9, %c0_10, %316, %c0_11], %319 {strides = array<i32>} : memref<1x3x32x128xf32, #tpu.memory_space<vmem>>, vector<1x1x32x128xf32>,
    %320 = vector.broadcast %111 : f32 to vector<32x128xf32>
    %321 = arith.mulf %214, %320 : vector<32x128xf32>
    %322 = vector.broadcast %91 : f32 to vector<32x128xf32>
    %323 = arith.addf %322, %321 : vector<32x128xf32>
    %324 = arith.mulf %214, %323 : vector<32x128xf32>
    %325 = vector.broadcast %79 : f32 to vector<32x128xf32>
    %326 = arith.addf %325, %324 : vector<32x128xf32>
    %327 = arith.mulf %214, %326 : vector<32x128xf32>
    %328 = vector.broadcast %73 : f32 to vector<32x128xf32>
    %329 = arith.addf %328, %327 : vector<32x128xf32>
    %330 = arith.mulf %214, %329 : vector<32x128xf32>
    %331 = vector.broadcast %123 : f32 to vector<32x128xf32>
    %332 = arith.mulf %214, %331 : vector<32x128xf32>
    %333 = vector.broadcast %95 : f32 to vector<32x128xf32>
    %334 = arith.addf %333, %332 : vector<32x128xf32>
    %335 = arith.mulf %214, %334 : vector<32x128xf32>
    %336 = vector.broadcast %83 : f32 to vector<32x128xf32>
    %337 = arith.addf %336, %335 : vector<32x128xf32>
    %338 = arith.mulf %214, %337 : vector<32x128xf32>
    %339 = vector.broadcast %71 : f32 to vector<32x128xf32>
    %340 = arith.addf %339, %338 : vector<32x128xf32>
    %341 = vector.broadcast %127 : f32 to vector<32x128xf32>
    %342 = arith.mulf %214, %341 : vector<32x128xf32>
    %343 = vector.broadcast %101 : f32 to vector<32x128xf32>
    %344 = arith.addf %343, %342 : vector<32x128xf32>
    %345 = arith.mulf %214, %344 : vector<32x128xf32>
    %346 = vector.broadcast %77 : f32 to vector<32x128xf32>
    %347 = arith.addf %346, %345 : vector<32x128xf32>
    %348 = vector.broadcast %119 : f32 to vector<32x128xf32>
    %349 = arith.mulf %214, %348 : vector<32x128xf32>
    %350 = vector.broadcast %89 : f32 to vector<32x128xf32>
    %351 = arith.addf %350, %349 : vector<32x128xf32>
    %352 = vector.broadcast %109 : f32 to vector<32x128xf32>
    %353 = arith.mulf %211, %352 : vector<32x128xf32>
    %354 = arith.addf %351, %353 : vector<32x128xf32>
    %355 = arith.mulf %211, %354 : vector<32x128xf32>
    %356 = arith.addf %347, %355 : vector<32x128xf32>
    %357 = arith.mulf %211, %356 : vector<32x128xf32>
    %358 = arith.addf %340, %357 : vector<32x128xf32>
    %359 = arith.mulf %211, %358 : vector<32x128xf32>
    %360 = arith.addf %330, %359 : vector<32x128xf32>
    %361 = vector.broadcast %121 : f32 to vector<32x128xf32>
    %362 = arith.mulf %214, %361 : vector<32x128xf32>
    %363 = vector.broadcast %97 : f32 to vector<32x128xf32>
    %364 = arith.addf %363, %362 : vector<32x128xf32>
    %365 = arith.mulf %214, %364 : vector<32x128xf32>
    %366 = vector.broadcast %85 : f32 to vector<32x128xf32>
    %367 = arith.addf %366, %365 : vector<32x128xf32>
    %368 = arith.mulf %214, %367 : vector<32x128xf32>
    %369 = vector.broadcast %69 : f32 to vector<32x128xf32>
    %370 = arith.addf %369, %368 : vector<32x128xf32>
    %371 = vector.broadcast %135 : f32 to vector<32x128xf32>
    %372 = arith.mulf %214, %371 : vector<32x128xf32>
    %373 = vector.broadcast %105 : f32 to vector<32x128xf32>
    %374 = arith.addf %373, %372 : vector<32x128xf32>
    %375 = arith.mulf %214, %374 : vector<32x128xf32>
    %376 = vector.broadcast %81 : f32 to vector<32x128xf32>
    %377 = arith.addf %376, %375 : vector<32x128xf32>
    %378 = vector.broadcast %133 : f32 to vector<32x128xf32>
    %379 = arith.mulf %214, %378 : vector<32x128xf32>
    %380 = vector.broadcast %93 : f32 to vector<32x128xf32>
    %381 = arith.addf %380, %379 : vector<32x128xf32>
    %382 = vector.broadcast %117 : f32 to vector<32x128xf32>
    %383 = arith.mulf %211, %382 : vector<32x128xf32>
    %384 = arith.addf %381, %383 : vector<32x128xf32>
    %385 = arith.mulf %211, %384 : vector<32x128xf32>
    %386 = arith.addf %377, %385 : vector<32x128xf32>
    %387 = arith.mulf %211, %386 : vector<32x128xf32>
    %388 = arith.addf %370, %387 : vector<32x128xf32>
    %389 = vector.broadcast %129 : f32 to vector<32x128xf32>
    %390 = arith.mulf %214, %389 : vector<32x128xf32>
    %391 = vector.broadcast %103 : f32 to vector<32x128xf32>
    %392 = arith.addf %391, %390 : vector<32x128xf32>
    %393 = arith.mulf %214, %392 : vector<32x128xf32>
    %394 = vector.broadcast %75 : f32 to vector<32x128xf32>
    %395 = arith.addf %394, %393 : vector<32x128xf32>
    %396 = vector.broadcast %131 : f32 to vector<32x128xf32>
    %397 = arith.mulf %214, %396 : vector<32x128xf32>
    %398 = vector.broadcast %99 : f32 to vector<32x128xf32>
    %399 = arith.addf %398, %397 : vector<32x128xf32>
    %400 = vector.broadcast %125 : f32 to vector<32x128xf32>
    %401 = arith.mulf %211, %400 : vector<32x128xf32>
    %402 = arith.addf %399, %401 : vector<32x128xf32>
    %403 = arith.mulf %211, %402 : vector<32x128xf32>
    %404 = arith.addf %395, %403 : vector<32x128xf32>
    %405 = vector.broadcast %115 : f32 to vector<32x128xf32>
    %406 = arith.mulf %214, %405 : vector<32x128xf32>
    %407 = vector.broadcast %87 : f32 to vector<32x128xf32>
    %408 = arith.addf %407, %406 : vector<32x128xf32>
    %409 = vector.broadcast %113 : f32 to vector<32x128xf32>
    %410 = arith.mulf %211, %409 : vector<32x128xf32>
    %411 = arith.addf %408, %410 : vector<32x128xf32>
    %412 = vector.broadcast %107 : f32 to vector<32x128xf32>
    %413 = arith.mulf %208, %412 : vector<32x128xf32>
    %414 = arith.addf %411, %413 : vector<32x128xf32>
    %415 = arith.mulf %208, %414 : vector<32x128xf32>
    %416 = arith.addf %404, %415 : vector<32x128xf32>
    %417 = arith.mulf %208, %416 : vector<32x128xf32>
    %418 = arith.addf %388, %417 : vector<32x128xf32>
    %419 = arith.mulf %208, %418 : vector<32x128xf32>
    %420 = arith.addf %360, %419 : vector<32x128xf32>
    %c0_12 = arith.constant 0 : index
    %c1_13 = arith.constant 1 : index
    %421 = arith.index_cast %205 : i32 to index
    %c0_14 = arith.constant 0 : index
    %422 = vector.load %arg4[%c0_12, %c1_13, %421, %c0_14] : memref<1x3x32x128xf32, #tpu.memory_space<vmem>>, vector<1x1x32x128xf32>
    %423 = vector.shape_cast %422 : vector<1x1x32x128xf32> to vector<32x128xf32>
    %424 = vector.shape_cast %420 : vector<32x128xf32> to vector<1x1x32x128xf32>
    tpu.vector_store %arg4[%c0_12, %c1_13, %421, %c0_14], %424 {strides = array<i32>} : memref<1x3x32x128xf32, #tpu.memory_space<vmem>>, vector<1x1x32x128xf32>,
    %425 = vector.broadcast %179 : f32 to vector<32x128xf32>
    %426 = arith.mulf %214, %425 : vector<32x128xf32>
    %427 = vector.broadcast %159 : f32 to vector<32x128xf32>
    %428 = arith.addf %427, %426 : vector<32x128xf32>
    %429 = arith.mulf %214, %428 : vector<32x128xf32>
    %430 = vector.broadcast %147 : f32 to vector<32x128xf32>
    %431 = arith.addf %430, %429 : vector<32x128xf32>
    %432 = arith.mulf %214, %431 : vector<32x128xf32>
    %433 = vector.broadcast %141 : f32 to vector<32x128xf32>
    %434 = arith.addf %433, %432 : vector<32x128xf32>
    %435 = arith.mulf %214, %434 : vector<32x128xf32>
    %436 = vector.broadcast %191 : f32 to vector<32x128xf32>
    %437 = arith.mulf %214, %436 : vector<32x128xf32>
    %438 = vector.broadcast %163 : f32 to vector<32x128xf32>
    %439 = arith.addf %438, %437 : vector<32x128xf32>
    %440 = arith.mulf %214, %439 : vector<32x128xf32>
    %441 = vector.broadcast %151 : f32 to vector<32x128xf32>
    %442 = arith.addf %441, %440 : vector<32x128xf32>
    %443 = arith.mulf %214, %442 : vector<32x128xf32>
    %444 = vector.broadcast %139 : f32 to vector<32x128xf32>
    %445 = arith.addf %444, %443 : vector<32x128xf32>
    %446 = vector.broadcast %195 : f32 to vector<32x128xf32>
    %447 = arith.mulf %214, %446 : vector<32x128xf32>
    %448 = vector.broadcast %169 : f32 to vector<32x128xf32>
    %449 = arith.addf %448, %447 : vector<32x128xf32>
    %450 = arith.mulf %214, %449 : vector<32x128xf32>
    %451 = vector.broadcast %145 : f32 to vector<32x128xf32>
    %452 = arith.addf %451, %450 : vector<32x128xf32>
    %453 = vector.broadcast %187 : f32 to vector<32x128xf32>
    %454 = arith.mulf %214, %453 : vector<32x128xf32>
    %455 = vector.broadcast %157 : f32 to vector<32x128xf32>
    %456 = arith.addf %455, %454 : vector<32x128xf32>
    %457 = vector.broadcast %177 : f32 to vector<32x128xf32>
    %458 = arith.mulf %211, %457 : vector<32x128xf32>
    %459 = arith.addf %456, %458 : vector<32x128xf32>
    %460 = arith.mulf %211, %459 : vector<32x128xf32>
    %461 = arith.addf %452, %460 : vector<32x128xf32>
    %462 = arith.mulf %211, %461 : vector<32x128xf32>
    %463 = arith.addf %445, %462 : vector<32x128xf32>
    %464 = arith.mulf %211, %463 : vector<32x128xf32>
    %465 = arith.addf %435, %464 : vector<32x128xf32>
    %466 = vector.broadcast %189 : f32 to vector<32x128xf32>
    %467 = arith.mulf %214, %466 : vector<32x128xf32>
    %468 = vector.broadcast %165 : f32 to vector<32x128xf32>
    %469 = arith.addf %468, %467 : vector<32x128xf32>
    %470 = arith.mulf %214, %469 : vector<32x128xf32>
    %471 = vector.broadcast %153 : f32 to vector<32x128xf32>
    %472 = arith.addf %471, %470 : vector<32x128xf32>
    %473 = arith.mulf %214, %472 : vector<32x128xf32>
    %474 = vector.broadcast %137 : f32 to vector<32x128xf32>
    %475 = arith.addf %474, %473 : vector<32x128xf32>
    %476 = vector.broadcast %203 : f32 to vector<32x128xf32>
    %477 = arith.mulf %214, %476 : vector<32x128xf32>
    %478 = vector.broadcast %173 : f32 to vector<32x128xf32>
    %479 = arith.addf %478, %477 : vector<32x128xf32>
    %480 = arith.mulf %214, %479 : vector<32x128xf32>
    %481 = vector.broadcast %149 : f32 to vector<32x128xf32>
    %482 = arith.addf %481, %480 : vector<32x128xf32>
    %483 = vector.broadcast %201 : f32 to vector<32x128xf32>
    %484 = arith.mulf %214, %483 : vector<32x128xf32>
    %485 = vector.broadcast %161 : f32 to vector<32x128xf32>
    %486 = arith.addf %485, %484 : vector<32x128xf32>
    %487 = vector.broadcast %185 : f32 to vector<32x128xf32>
    %488 = arith.mulf %211, %487 : vector<32x128xf32>
    %489 = arith.addf %486, %488 : vector<32x128xf32>
    %490 = arith.mulf %211, %489 : vector<32x128xf32>
    %491 = arith.addf %482, %490 : vector<32x128xf32>
    %492 = arith.mulf %211, %491 : vector<32x128xf32>
    %493 = arith.addf %475, %492 : vector<32x128xf32>
    %494 = vector.broadcast %197 : f32 to vector<32x128xf32>
    %495 = arith.mulf %214, %494 : vector<32x128xf32>
    %496 = vector.broadcast %171 : f32 to vector<32x128xf32>
    %497 = arith.addf %496, %495 : vector<32x128xf32>
    %498 = arith.mulf %214, %497 : vector<32x128xf32>
    %499 = vector.broadcast %143 : f32 to vector<32x128xf32>
    %500 = arith.addf %499, %498 : vector<32x128xf32>
    %501 = vector.broadcast %199 : f32 to vector<32x128xf32>
    %502 = arith.mulf %214, %501 : vector<32x128xf32>
    %503 = vector.broadcast %167 : f32 to vector<32x128xf32>
    %504 = arith.addf %503, %502 : vector<32x128xf32>
    %505 = vector.broadcast %193 : f32 to vector<32x128xf32>
    %506 = arith.mulf %211, %505 : vector<32x128xf32>
    %507 = arith.addf %504, %506 : vector<32x128xf32>
    %508 = arith.mulf %211, %507 : vector<32x128xf32>
    %509 = arith.addf %500, %508 : vector<32x128xf32>
    %510 = vector.broadcast %183 : f32 to vector<32x128xf32>
    %511 = arith.mulf %214, %510 : vector<32x128xf32>
    %512 = vector.broadcast %155 : f32 to vector<32x128xf32>
    %513 = arith.addf %512, %511 : vector<32x128xf32>
    %514 = vector.broadcast %181 : f32 to vector<32x128xf32>
    %515 = arith.mulf %211, %514 : vector<32x128xf32>
    %516 = arith.addf %513, %515 : vector<32x128xf32>
    %517 = vector.broadcast %175 : f32 to vector<32x128xf32>
    %518 = arith.mulf %208, %517 : vector<32x128xf32>
    %519 = arith.addf %516, %518 : vector<32x128xf32>
    %520 = arith.mulf %208, %519 : vector<32x128xf32>
    %521 = arith.addf %509, %520 : vector<32x128xf32>
    %522 = arith.mulf %208, %521 : vector<32x128xf32>
    %523 = arith.addf %493, %522 : vector<32x128xf32>
    %524 = arith.mulf %208, %523 : vector<32x128xf32>
    %525 = arith.addf %465, %524 : vector<32x128xf32>
    %c0_15 = arith.constant 0 : index
    %c2_16 = arith.constant 2 : index
    %526 = arith.index_cast %205 : i32 to index
    %c0_17 = arith.constant 0 : index
    %527 = vector.load %arg4[%c0_15, %c2_16, %526, %c0_17] : memref<1x3x32x128xf32, #tpu.memory_space<vmem>>, vector<1x1x32x128xf32>
    %528 = vector.shape_cast %527 : vector<1x1x32x128xf32> to vector<32x128xf32>
    %529 = vector.shape_cast %525 : vector<32x128xf32> to vector<1x1x32x128xf32>
    tpu.vector_store %arg4[%c0_15, %c2_16, %526, %c0_17], %529 {strides = array<i32>} : memref<1x3x32x128xf32, #tpu.memory_space<vmem>>, vector<1x1x32x128xf32>,
    %c1_i32 = arith.constant 1 : i32
    return
  }
  func.func @transform_0(%arg0: i32, %arg1: i32) -> (i32, i32) {
    %c0_i32 = arith.constant 0 : i32
    %c0_i32_0 = arith.constant 0 : i32
    %c0_i32_1 = arith.constant 0 : i32
    return %c0_i32, %c0_i32_0 : i32, i32
  }
  func.func @transform_1(%arg0: i32, %arg1: i32) -> (i32, i32, i32, i32) {
    %c0_i32 = arith.constant 0 : i32
    %c0_i32_0 = arith.constant 0 : i32
    %c0_i32_1 = arith.constant 0 : i32
    return %arg0, %c0_i32, %arg1, %c0_i32_0 : i32, i32, i32, i32
  }
  func.func @transform_2(%arg0: i32, %arg1: i32) -> (i32, i32, i32, i32) {
    %c0_i32 = arith.constant 0 : i32
    %c0_i32_0 = arith.constant 0 : i32
    %c0_i32_1 = arith.constant 0 : i32
    return %arg0, %c0_i32, %arg1, %c0_i32_0 : i32, i32, i32, i32
  }
}

</mosaic_0001>

<bundles_post_ra>
// kernel: color_temp_tuning_forward.2
= control target key start
LH: loop header
LB: loop body
LE: loop exit
PB: predicated region body
PF: predicated region fallthrough
CT: control target
= control target key end

     0   :  { %10 = vsyncpa [#allocation3], 0  ;;  %s643_s0 = inlined_call_operand.vmem [shape: f32[2,10], index: 0, kind: input, shape index: {}]   ;;  %s644_s1 = inlined_call_operand.vmem [shape: f32[10,128], index: 1, kind: input, shape index: {}]   ;;  %s645_s2 = inlined_call_operand.vmem [shape: f32[128,256], index: 2, kind: input, shape index: {}]   ;;  %s646_s3 = inlined_call_operand.vmem [shape: f32[256,128], index: 3, kind: input, shape index: {}]   ;;  %s647_s4 = inlined_call_operand.vmem [shape: f32[2], index: 4, kind: input, shape index: {}]   ;;  %s648_s5 = inlined_call_operand.vmem [shape: f32[2,128], index: 5, kind: output, shape index: {}]  }
   0x1   :  { %s25_s20 = sshll.u32 %s647_s4, 4  ;;  %s26_s20 = int_to_ptr.vmem [resolvable:$true] %s25_s20 }
   0x2   :  { %s389_s21 = scalar_lea.vmem %s26_s20, 16  ;;  %p394_p1 = scmp.lt.s32.totalorder %s26_s20, %s26_s20 }
   0x3   :  { %p390_p0 = scmp.ne.s32.totalorder %s26_s20, %s389_s21  ;;  %p395_p2 = scmp.lt.s32.totalorder %s389_s21, %s389_s21 }
   0x5   :  { %p396_p3 = por %p395_p2, %p394_p1 }
   0x7   :  { %p397_p4 = pnand %p396_p3, %p390_p0 }
   0x9   :  { %400 = shalt.err (!%p397_p4)
}
   0xa   :  { %s403_s22 = smov [#allocation2]  }
   0xb   :  { %28 = dma.vmem_to_smem %s26_s20, 16, %s403_s22, [#allocation3]  }
   0xc   :  { %401 = dma.done.wait [#allocation3], 16  }
   0xd   :  { %402 = vsyncadd [#allocation3], 4294967280 }
   0xe   :  { %32 = sfence }
   0xf   :  { %v37_v0 = vld [vmem:[%s644_s1 + $0x8] sm:$0x3]  ;;  %vm42_vm0 = vcmask 1041408   ;;  %v404_v1 = vmov 0.0   ;;  %v36_v2 = vld [vmem:[%s644_s1] sm:$0xff]  ;;  %vm405_vm1 = vmmov 0  }
  0x10   :  { %379 = vmatprep.subr.mxu0 %v404_v1  ;;  %383 = vmatprep.mubr.msk.f32.mxu0 %vm405_vm1, %v404_v1  ;;  %v151_v3 = vld [vmem:[%s645_s2 + $0xf8] sm:$0xff]  ;;  %v150_v4 = vld [vmem:[%s645_s2 + $0xf0] sm:$0xff]  ;;  %v35_v5 = vld [vmem:[%s643_s0] sm:$0x3]  ;;  %vm38_vm2 = vcmask 80896   ;;  %s33_s28 = sld [smem:[#allocation2]] }
  0x11   :  { %380 = vmatpush3.msk.msra.mxu0 %vm42_vm0, %v37_v0  ;;  %152 = vmatprep.subr.mxu1 %v151_v3  ;;  %v149_v6 = vld [vmem:[%s645_s2 + $0xe8] sm:$0xff]  ;;  %v148_v7 = vld [vmem:[%s645_s2 + $0xe0] sm:$0xff]  ;;  %v147_v8 = vld [vmem:[%s645_s2 + $0xd8] sm:$0xff]  ;;  %s338_s16 = sld [smem:[#allocation2 + $0x1]] }
  0x12   :  { %381 = vmatprep.subr.mxu0 %v404_v1  ;;  %153 = vmatpush1.msra.mxu1 %v150_v4  ;;  %v146_v9 = vld [vmem:[%s645_s2 + $0xd0] sm:$0xff]  ;;  %v145_v10 = vld [vmem:[%s645_s2 + $0xc8] sm:$0xff]  ;;  %v144_v11 = vld [vmem:[%s645_s2 + $0xc0] sm:$0xff] }
  0x13   :  { %382 = vmatpush3.msra.mxu0 %v36_v2  ;;  %154 = vmatprep.subr.mxu1 %v149_v6  ;;  %v143_v12 = vld [vmem:[%s645_s2 + $0xb8] sm:$0xff]  ;;  %v142_v13 = vld [vmem:[%s645_s2 + $0xb0] sm:$0xff]  ;;  %v141_v14 = vld [vmem:[%s645_s2 + $0xa8] sm:$0xff] }
  0x14   :  { %384 = vmatmul.mubr.msk.f32.vlgmr.msra.gmra.mxu0 %vm38_vm2, %v35_v5  ;;  %155 = vmatpush1.msra.mxu1 %v148_v7  ;;  %v140_v15 = vld [vmem:[%s645_s2 + $0xa0] sm:$0xff]  ;;  %v139_v16 = vld [vmem:[%s645_s2 + $0x98] sm:$0xff]  ;;  %v138_v17 = vld [vmem:[%s645_s2 + $0x90] sm:$0xff] }
  0x15   :  { %156 = vmatprep.subr.mxu1 %v147_v8  ;;  %216 = vmatprep.mubr.f32.mxu1 %v404_v1  ;;  %v137_v18 = vld [vmem:[%s645_s2 + $0x88] sm:$0xff]  ;;  %v136_v19 = vld [vmem:[%s645_s2 + $0x80] sm:$0xff]  ;;  %v135_v20 = vld [vmem:[%s645_s2 + $0x78] sm:$0xff] }
  0x16   :  { %157 = vmatpush1.msra.mxu1 %v146_v9  ;;  %v134_v21 = vld [vmem:[%s645_s2 + $0x70] sm:$0xff]  ;;  %v133_v22 = vld [vmem:[%s645_s2 + $0x68] sm:$0xff]  ;;  %v132_v23 = vld [vmem:[%s645_s2 + $0x60] sm:$0xff]  ;;  %v117_v61 = vstv %s33_s28 }
  0x17   :  { %158 = vmatprep.subr.mxu1 %v145_v10  ;;  %v131_v24 = vld [vmem:[%s645_s2 + $0x58] sm:$0xff]  ;;  %v130_v25 = vld [vmem:[%s645_s2 + $0x50] sm:$0xff]  ;;  %v129_v26 = vld [vmem:[%s645_s2 + $0x48] sm:$0xff]  ;;  %v225_v9 = vstv %s338_s16 }
  0x18   :  { %159 = vmatpush1.msra.mxu1 %v144_v11  ;;  %v128_v27 = vld [vmem:[%s645_s2 + $0x40] sm:$0xff]  ;;  %v127_v28 = vld [vmem:[%s645_s2 + $0x38] sm:$0xff]  ;;  %v126_v29 = vld [vmem:[%s645_s2 + $0x30] sm:$0xff] }
  0x19   :  { %160 = vmatprep.subr.mxu1 %v143_v12  ;;  %v125_v30 = vld [vmem:[%s645_s2 + $0x28] sm:$0xff]  ;;  %v124_v31 = vld [vmem:[%s645_s2 + $0x20] sm:$0xff]  ;;  %v123_v32 = vld [vmem:[%s645_s2 + $0x18] sm:$0xff] }
  0x1a   :  { %161 = vmatpush1.msra.mxu1 %v142_v13  ;;  %v122_v33 = vld [vmem:[%s645_s2 + $0x10] sm:$0xff]  ;;  %v121_v34 = vld [vmem:[%s645_s2 + $0x8] sm:$0xff]  ;;  %v120_v35 = vld [vmem:[%s645_s2] sm:$0xff] }
  0x1b   :  { %162 = vmatprep.subr.mxu1 %v141_v14  ;;  %v261_v36 = vld [vmem:[%s646_s3 + $0xf8] sm:$0xff]  ;;  %v260_v38 = vld [vmem:[%s646_s3 + $0xf0] sm:$0xff]  ;;  %v259_v40 = vld [vmem:[%s646_s3 + $0xe8] sm:$0xff] }
  0x1c   :  { %163 = vmatpush1.msra.mxu1 %v140_v15  ;;  %v245_v37 = vld [vmem:[%s646_s3 + $0x78] sm:$0xff]  ;;  %344 = vmatprep.subr.mxu0 %v261_v36  ;;  %v244_v39 = vld [vmem:[%s646_s3 + $0x70] sm:$0xff]  ;;  %v243_v41 = vld [vmem:[%s646_s3 + $0x68] sm:$0xff] }
  0x1d   :  { %164 = vmatprep.subr.mxu1 %v139_v16  ;;  %345 = vmatpush3.msra.mxu0 %v245_v37  ;;  %v258_v42 = vld [vmem:[%s646_s3 + $0xe0] sm:$0xff]  ;;  %v257_v44 = vld [vmem:[%s646_s3 + $0xd8] sm:$0xff]  ;;  %v256_v46 = vld [vmem:[%s646_s3 + $0xd0] sm:$0xff] }
  0x1e   :  { %165 = vmatpush1.msra.mxu1 %v138_v17  ;;  %346 = vmatprep.subr.mxu0 %v260_v38  ;;  %v242_v43 = vld [vmem:[%s646_s3 + $0x60] sm:$0xff]  ;;  %v241_v45 = vld [vmem:[%s646_s3 + $0x58] sm:$0xff]  ;;  %v240_v47 = vld [vmem:[%s646_s3 + $0x50] sm:$0xff] }
  0x1f   :  { %166 = vmatprep.subr.mxu1 %v137_v18  ;;  %347 = vmatpush3.msra.mxu0 %v244_v39  ;;  %v255_v48 = vld [vmem:[%s646_s3 + $0xc8] sm:$0xff]  ;;  %v254_v50 = vld [vmem:[%s646_s3 + $0xc0] sm:$0xff]  ;;  %v253_v52 = vld [vmem:[%s646_s3 + $0xb8] sm:$0xff] }
  0x20   :  { %167 = vmatpush1.msra.mxu1 %v136_v19  ;;  %348 = vmatprep.subr.mxu0 %v259_v40  ;;  %v239_v49 = vld [vmem:[%s646_s3 + $0x48] sm:$0xff]  ;;  %v238_v51 = vld [vmem:[%s646_s3 + $0x40] sm:$0xff]  ;;  %v237_v53 = vld [vmem:[%s646_s3 + $0x38] sm:$0xff] }
  0x21   :  { %168 = vmatprep.subr.mxu1 %v135_v20  ;;  %349 = vmatpush3.msra.mxu0 %v243_v41  ;;  %v252_v54 = vld [vmem:[%s646_s3 + $0xb0] sm:$0xff]  ;;  %v251_v56 = vld [vmem:[%s646_s3 + $0xa8] sm:$0xff]  ;;  %v250_v58 = vld [vmem:[%s646_s3 + $0xa0] sm:$0xff] }
  0x22   :  { %169 = vmatpush1.msra.mxu1 %v134_v21  ;;  %350 = vmatprep.subr.mxu0 %v258_v42  ;;  %v236_v55 = vld [vmem:[%s646_s3 + $0x30] sm:$0xff]  ;;  %v235_v57 = vld [vmem:[%s646_s3 + $0x28] sm:$0xff]  ;;  %v234_v59 = vld [vmem:[%s646_s3 + $0x20] sm:$0xff] }
  0x23   :  { %170 = vmatprep.subr.mxu1 %v133_v22  ;;  %351 = vmatpush3.msra.mxu0 %v242_v43  ;;  %v249_v60 = vld [vmem:[%s646_s3 + $0x98] sm:$0xff]  ;;  %v248_v3 = vld [vmem:[%s646_s3 + $0x90] sm:$0xff]  ;;  %v247_v5 = vld [vmem:[%s646_s3 + $0x88] sm:$0xff] }
  0x24   :  { %171 = vmatpush1.msra.mxu1 %v132_v23  ;;  %352 = vmatprep.subr.mxu0 %v257_v44  ;;  %v233_v2 = vld [vmem:[%s646_s3 + $0x18] sm:$0xff]  ;;  %v232_v4 = vld [vmem:[%s646_s3 + $0x10] sm:$0xff]  ;;  %v231_v6 = vld [vmem:[%s646_s3 + $0x8] sm:$0xff] }
  0x25   :  { %172 = vmatprep.subr.mxu1 %v131_v24  ;;  %353 = vmatpush3.msra.mxu0 %v241_v45  ;;  %v246_v7 = vld [vmem:[%s646_s3 + $0x80] sm:$0xff] }
  0x26   :  { %173 = vmatpush1.msra.mxu1 %v130_v25  ;;  %354 = vmatprep.subr.mxu0 %v256_v46  ;;  %v230_v8 = vld [vmem:[%s646_s3] sm:$0xff] }
  0x27   :  { %174 = vmatprep.subr.mxu1 %v129_v26  ;;  %355 = vmatpush3.msra.mxu0 %v240_v47 }
  0x28   :  { %175 = vmatpush1.msra.mxu1 %v128_v27  ;;  %356 = vmatprep.subr.mxu0 %v255_v48 }
  0x29   :  { %176 = vmatprep.subr.mxu1 %v127_v28  ;;  %357 = vmatpush3.msra.mxu0 %v239_v49 }
  0x2a   :  { %177 = vmatpush1.msra.mxu1 %v126_v29  ;;  %358 = vmatprep.subr.mxu0 %v254_v50 }
  0x2b   :  { %178 = vmatprep.subr.mxu1 %v125_v30  ;;  %359 = vmatpush3.msra.mxu0 %v238_v51 }
  0x2c   :  { %179 = vmatpush1.msra.mxu1 %v124_v31  ;;  %360 = vmatprep.subr.mxu0 %v253_v52 }
  0x2d   :  { %180 = vmatprep.subr.mxu1 %v123_v32  ;;  %361 = vmatpush3.msra.mxu0 %v237_v53 }
  0x2e   :  { %181 = vmatpush1.msra.mxu1 %v122_v33  ;;  %362 = vmatprep.subr.mxu0 %v252_v54 }
  0x2f   :  { %182 = vmatprep.subr.mxu1 %v121_v34  ;;  %363 = vmatpush3.msra.mxu0 %v236_v55 }
  0x30   :  { %183 = vmatpush1.msra.mxu1 %v120_v35  ;;  %364 = vmatprep.subr.mxu0 %v251_v56 }
  0x31   :  { %365 = vmatpush3.msra.mxu0 %v235_v57 }
  0x32   :  { %366 = vmatprep.subr.mxu0 %v250_v58 }
  0x33   :  { %367 = vmatpush3.msra.mxu0 %v234_v59 }
  0x34   :  { %368 = vmatprep.subr.mxu0 %v249_v60 }
  0x35   :  { %369 = vmatpush3.msra.mxu0 %v233_v2 }
  0x36   :  { %370 = vmatprep.subr.mxu0 %v248_v3 }
  0x37   :  { %371 = vmatpush3.msra.mxu0 %v232_v4 }
  0x38   :  { %372 = vmatprep.subr.mxu0 %v247_v5 }
  0x39   :  { %373 = vmatpush3.msra.mxu0 %v231_v6 }
  0x3a   :  { %374 = vmatprep.subr.mxu0 %v246_v7 }
  0x3b   :  { %375 = vmatpush3.msra.mxu0 %v230_v8 }
  0xd4   :  { %v112_v62 = vpop.f32.mrf.mxu0 }
  0xd5   :  { %vm116_vm3 = vcmp.gt.f32.partialorder %v112_v62, 0.0  ;;  %v118_v63 = vmul.f32 %v117_v61, %v112_v62 }
  0xd6   :  { %v385_v0 = vpop.f32.mrf.mxu0 }
  0xd7   :  { %v119_v1 = vsel %vm116_vm3, %v112_v62, %v118_v63 }
  0xd8   :  { %217 = vmatmul.mubr.f32.vlgmr.msra.gmra.mxu1 %v119_v1 }
 0x198   :  { %v218_v10 = vpop.f32.mrf.mxu1 }
 0x199   :  { %v226_v12 = vmul.f32 %v225_v9, %v218_v10  ;;  %vm223_vm4 = vcmp.gt.f32.partialorder %v218_v10, 0.0 }
 0x19a   :  { %v220_v11 = vpop.f32.mrf.mxu1 }
 0x19b   :  { %vm224_vm5 = vcmp.gt.f32.partialorder %v220_v11, 0.0  ;;  %v227_v13 = vmul.f32 %v225_v9, %v220_v11  ;;  %v228_v15 = vsel %vm223_vm4, %v218_v10, %v226_v12 }
 0x19d   :  { %v229_v14 = vsel %vm224_vm5, %v220_v11, %v227_v13 }
 0x19e   :  { %326 = vmatprep.mubr.f32.mxu0 %v229_v14 }
 0x19f   :  { %327 = vmatmul.mubr.f32.vlgmr.msra.gmra.mxu0 %v228_v15 }
 0x25f   :  { %v376_v16 = vpop.f32.mrf.mxu0 }
 0x261   :  { %v377_v17 = vpop.f32.mrf.mxu0 }
 0x262   :  { %v378_v18 = vadd.f32 %v377_v17, %v376_v16 }
 0x264   :  { %332 = vst [vmem:[%s648_s5] sm:$0x3] %v378_v18 }
 0x265   :  { %337 = vsyncpa [#allocation3], 1 }

// kernel: color_temp_tuning_forward.3
= control target key start
LH: loop header
LB: loop body
LE: loop exit
PB: predicated region body
PF: predicated region fallthrough
CT: control target
= control target key end

     0   :  { %s2394_s0 = inlined_call_operand.vmem [shape: f32[2,128], index: 0, kind: input, shape index: {}]   ;;  %s2395_s1 = inlined_call_operand.vmem [shape: f32[2,3,2,128], index: 1, kind: input, shape index: {}]   ;;  %s2396_s2 = inlined_call_operand.vmem [shape: f32[2,3,2,128], index: 2, kind: output, shape index: {}]  }
   0x1   :  { %2403 = sst [smem:[#allocation14_spill]] %s2394_s0 }
   0x2   :  { %2404 = sst [smem:[#allocation15_spill]] %s2395_s1 }
   0x3   :  { %2405 = sst [smem:[#allocation16_spill]] %s2396_s2 }
   0x4   :  { %7 = vsyncpa [#allocation3], 0  ;;  %s1855_s9 = smov 0   ;;  %s1857_s10 = smov 0  }
   0x5   :  { %s1859_s11 = smov 0   ;;  %s1861_s12 = smov 0  }
   0x6   :  { %s1863_s13 = smov 0  }
   0x7 LB: > { %2406 = sst [smem:[#allocation7_spill]] %s1817_s10  ;;  %s1576_s14 = sadd.s32 4294967295, %s1829_s13   ;;  %s1829_s13 = sphi %s1863_s13, %s13_s13   ;;  %s1825_s12 = sphi %s1861_s12, %s2427_s12   ;;  %s1821_s11 = sphi %s1859_s11, %s2426_s11   ;;  %s1817_s10 = sphi %s1857_s10, %s2425_s10   ;;  %s1813_s9 = sphi %s1855_s9, %s2424_s9  }
   0x8   : > { %2407 = sst [smem:[#allocation8_spill]] %s1821_s11  ;;  %s25_s15 = sadd.s32 1, %s1825_s12 }
   0x9   : > { %2408 = sst [smem:[#allocation9_spill]] %s1825_s12  ;;  %p27_p0 = scmp.ge.s32.totalorder %s25_s15, 2 }
   0xa   : > { %2409 = sst [smem:[#allocation10_spill]] %s1829_s13  ;;  %s55_s16 = sadd.s32 1, %s1817_s10 }
   0xb   : > { %p62_p1 = scmp.ne.s32.totalorder %s1817_s10, %s1813_s9  ;;  %p63_p2 = scmp.eq.s32.totalorder %s1829_s13, 0 }
   0xc   : > { %s2429_s15 = smov (%p27_p0, %s25_s15), 0  ;;  %p94_p4 = scmp.eq.s32.totalorder %s1576_s14, 1 }
   0xd   : > { %2410 = sst [smem:[#allocation11_spill]] %s2429_s15  ;;  %p1888_p3 = por %p63_p2, %p62_p1 }
   0xe   : > { %s50_s18 = ssub.s32 %s1825_s12, %s2429_s15  ;;  %p1578_p5 = scmp.ge.s32.totalorder %s1829_s13, 1 }
   0xf   : > { %p53_p6 = scmp.eq.s32.totalorder %s50_s18, 0  ;;  %p1895_p7 = por %p94_p4, %p62_p1 }
  0x10   : > { %p107_p8 = scmp.lt.s32.totalorder %s1829_s13, 3  ;;  %p1907_p10 = scmp.eq.s32.totalorder %s1576_s14, 0 }
  0x11   : > { %s2412_s19 = scalar_select %p1895_p7, 1, 0 }
  0x12   : > { %s1901_s20 = scalar_select %p53_p6, %s1817_s10, %s55_s16  }
  0x13   : > { %2413 = sst [smem:[#allocation12_spill]] %s2412_s19  ;;  %p1903_p9 = pnand %p1578_p5, %p107_p8 }
  0x14   : > { %2414 = sst [smem:[#allocation13_spill]] %s1901_s20 }
  0x15   : > { %s2417_s0 = sld [smem:[#allocation14_spill]]  ;;  %p1616_p11 = pneg %p1903_p9 }
  0x17   : > { %p1617_p12 = pnand %p1907_p10, %p1616_p11 }
  0x19   : > { %p1742_p0 = pneg %p1617_p12 }
  0x1b   : > { %s120_s25 = sshll.u32 %s2417_s0, 4  ;;  %s121_s25 = int_to_ptr.vmem [resolvable:$true] %s120_s25 }
  0x1c   : > { %s1740_s26 = scalar_lea.vmem %s121_s25, 32  ;;  %p1748_p4 = scmp.lt.s32.totalorder %s121_s25, %s121_s25 }
  0x1d   : > { %p1741_p13 = scmp.ne.s32.totalorder %s121_s25, %s1740_s26  ;;  %p1749_p5 = scmp.lt.s32.totalorder %s1740_s26, %s1740_s26 }
  0x1f   : > { %p1743_p1 = pnand %p1742_p0, %p1741_p13  ;;  %p1750_p6 = por %p1749_p5, %p1748_p4 }
  0x21   : > { %p1744_p2 = pneg %p1743_p1 }
  0x23   : > { %p1751_p8 = pnand %p1750_p6, %p1744_p2 }
  0x25   : > { %1754 = shalt.err (!%p1751_p8)
}
  0x26   : > { %s1839_s27 = smov [#allocation2]   ;;  %p1580_p7 = scmp.ge.s32.totalorder %s1829_s13, 2 }
  0x27   : > { %1619 = dma.vmem_to_smem (!%p1617_p12), %s121_s25, 32, %s1839_s27, [#allocation3]  }
  0x28   : > { %127 = sbr.rel (%p1580_p7) target bundleno = 62 (0x3e), region = 20 }
  0x2d   : > { %130 = sbr.rel (!%p1888_p3) target bundleno = 62 (0x3e), region = 24  ;;  %s132_s28 = sand.u32 (%p1888_p3), 1, %s1817_s10  }
  0x2e   : > { %s1609_s29 = smul.u32 (%p1888_p3), 6, %s1825_s12  ;;  %s2418_s1 = sld [smem:[#allocation15_spill]] (%p1888_p3) }
  0x2f   : > { %s1608_s30 = smul.u32 (%p1888_p3), 96, %s132_s28  ;;  %s1831_s7 = smov (%p1888_p3), 0  }
  0x31   : > { %s134_s6 = scalar_lea.vmem (%p1888_p3), [#allocation4], %s1608_s30  }
  0x34   : > { %s142_s5 = scalar_lea.vmem %s2418_s1, %s1609_s29  }
  0x35 LB: >> { %v161_v0 = vld [vmem:[%s142_s5] sm:$0x3]  ;;  %v163_v1 = vld [vmem:[%s142_s5 + $0x2] sm:$0x3]  ;;  %v165_v2 = vld [vmem:[%s142_s5 + $0x4] sm:$0x3]  ;;  %s1833_s7 = sphi %s1831_s7, %s155_s7  }
  0x36   : >> { %162 = vst [vmem:[%s134_s6] sm:$0x3] %v161_v0  ;;  %164 = vst [vmem:[%s134_s6 + $0x20] sm:$0x3] %v163_v1  ;;  %s155_s7 = sadd.s32 1, %s1833_s7  }
  0x37   : >> { %166 = vst [vmem:[%s134_s6 + $0x40] sm:$0x3] %v165_v2  ;;  %p154_p3 = scmp.ge.s32.totalorder %s155_s7, 1 }
  0x39   : > { %157 = sbr.rel (!%p154_p3) target bundleno = 53 (0x35), region = 140 }
  0x3e PF: > { %206 = sbr.rel (%p1903_p9) target bundleno = 211 (0xd3), region = 58 }
  0x43   : > { %1808 = dma.done.wait (%p1907_p10), [#allocation3], 32  }
  0x44   : > { %1810 = vsyncadd (%p1907_p10), [#allocation3], 4294967264  ;;  %s213_s8 = sand.u32 1, %s1813_s9  }
  0x45   : > { %s1933_s14 = smul.u32 96, %s213_s8 }
  0x47   : > { %s1936_s16 = scalar_lea.vmem [#allocation4], %s1933_s14 }
  0x48   : > { %219 = sfence }
  0x49   : > { %s1939_s17 = sshll.u32 %s1821_s11, 7  ;;  %v2012_v3 = vld [vmem:[%s1936_s16] sm:$0xff] }
  0x4a   : > { %s1942_s18 = sld [smem:[#allocation2 + %s1939_s17]]  ;;  %s242_s9 = sadd.s32 1, %s1939_s17  ;;  %v2028_v11 = vld [vmem:[%s1936_s16 + $0x20] sm:$0xff] }
  0x4b   : > { %s1945_s21 = sld [smem:[#allocation2 + %s242_s9]]  ;;  %s244_s22 = sadd.s32 2, %s1939_s17  ;;  %v2037_v16 = vld [vmem:[%s1936_s16 + $0x40] sm:$0xff] }
  0x4c   : > { %s1948_s23 = sld [smem:[#allocation2 + %s244_s22]]  ;;  %s246_s24 = sadd.s32 3, %s1939_s17 }
  0x4d   : > { %s1951_s25 = sld [smem:[#allocation2 + %s246_s24]]  ;;  %s248_s26 = sadd.s32 4, %s1939_s17 }
  0x4e   : > { %s1954_s27 = sld [smem:[#allocation2 + %s248_s26]]  ;;  %s250_s28 = sadd.s32 5, %s1939_s17 }
  0x4f   : > { %s1957_s29 = sld [smem:[#allocation2 + %s250_s28]]  ;;  %s252_s30 = sadd.s32 6, %s1939_s17 }
  0x50   : > { %s1960_s3 = sld [smem:[#allocation2 + %s252_s30]]  ;;  %s254_s4 = sadd.s32 7, %s1939_s17  ;;  %v605_v6 = vstv %s1942_s18 }
  0x51   : > { %s1963_s5 = sld [smem:[#allocation2 + %s254_s4]]  ;;  %s256_s6 = sadd.s32 8, %s1939_s17  ;;  %v515_v5 = vstv %s1945_s21 }
  0x52   : > { %s1966_s7 = sld [smem:[#allocation2 + %s256_s6]]  ;;  %s258_s8 = sadd.s32 9, %s1939_s17  ;;  %v483_v4 = vstv %s1948_s23 }
  0x53   : > { %s1969_s9 = sld [smem:[#allocation2 + %s258_s8]]  ;;  %s260_s22 = sadd.s32 10, %s1939_s17  ;;  %v678_v10 = vstv %s1951_s25 }
  0x54   : > { %s1972_s24 = sld [smem:[#allocation2 + %s260_s22]]  ;;  %s262_s26 = sadd.s32 11, %s1939_s17  ;;  %v534_v8 = vstv %s1954_s27 }
  0x55   : > { %s1975_s28 = sld [smem:[#allocation2 + %s262_s26]]  ;;  %s264_s30 = sadd.s32 12, %s1939_s17  ;;  %v474_v7 = vstv %s1957_s29 }
  0x56   : > { %s1978_s4 = sld [smem:[#allocation2 + %s264_s30]]  ;;  %s266_s0 = sadd.s32 13, %s1939_s17  ;;  %v624_v9 = vstv %s1960_s3 }
  0x57   : > { %s1981_s6 = sld [smem:[#allocation2 + %s266_s0]]  ;;  %s268_s1 = sadd.s32 14, %s1939_s17  ;;  %v506_v12 = vstv %s1963_s5 }
  0x58   : > { %s1984_s8 = sld [smem:[#allocation2 + %s268_s1]]  ;;  %s270_s15 = sadd.s32 15, %s1939_s17  ;;  %v596_v14 = vstv %s1966_s7 }
  0x59   : > { %s1987_s22 = sld [smem:[#allocation2 + %s270_s15]]  ;;  %s272_s12 = sadd.s32 16, %s1939_s17  ;;  %v715_v15 = vstv %s1969_s9 }
  0x5a   : > { %s1990_s26 = sld [smem:[#allocation2 + %s272_s12]]  ;;  %s274_s30 = sadd.s32 17, %s1939_s17  ;;  %v544_v13 = vstv %s1972_s24 }
  0x5b   : > { %s1993_s20 = sld [smem:[#allocation2 + %s274_s30]]  ;;  %s276_s0 = sadd.s32 18, %s1939_s17  ;;  %v465_v17 = vstv %s1975_s28 }
  0x5c   : > { %s1996_s10 = sld [smem:[#allocation2 + %s276_s0]]  ;;  %s278_s1 = sadd.s32 19, %s1939_s17  ;;  %v634_v19 = vstv %s1978_s4 }
  0x5d   : > { %s1999_s13 = sld [smem:[#allocation2 + %s278_s1]]  ;;  %s280_s15 = sadd.s32 20, %s1939_s17  ;;  %v497_v18 = vstv %s1981_s6 }
  0x5e   : > { %s2002_s2 = sld [smem:[#allocation2 + %s280_s15]]  ;;  %s282_s12 = sadd.s32 21, %s1939_s17  ;;  %v587_v23 = vstv %s1984_s8 }
  0x5f   : > { %s2005_s11 = sld [smem:[#allocation2 + %s282_s12]]  ;;  %s284_s30 = sadd.s32 22, %s1939_s17  ;;  %v688_v24 = vstv %s1987_s22 }
  0x60   : > { %s2008_s19 = sld [smem:[#allocation2 + %s284_s30]]  ;;  %s286_s0 = sadd.s32 23, %s1939_s17  ;;  %v525_v21 = vstv %s1990_s26 }
  0x61   : > { %s2017_s1 = sld [smem:[#allocation2 + %s286_s0]]  ;;  %s288_s15 = sadd.s32 24, %s1939_s17  ;;  %v669_v27 = vstv %s1993_s20 }
  0x62   : > { %s2024_s12 = sld [smem:[#allocation2 + %s288_s15]]  ;;  %s290_s21 = sadd.s32 25, %s1939_s17  ;;  %v615_v26 = vstv %s1996_s10 }
  0x63   : > { %s2034_s23 = sld [smem:[#allocation2 + %s290_s21]]  ;;  %v729_v20 = vstv %s1999_s13  ;;  %s294_s27 = sadd.s32 27, %s1939_s17 }
  0x64   : > { %v549_v22 = vstv %s2002_s2  ;;  %s295_s29 = sld [smem:[#allocation2 + %s294_s27]]  ;;  %v2052_v28 = vmul.f32 %v729_v20, %v2012_v3  ;;  %s298_s13 = sadd.s32 29, %s1939_s17 }
  0x65   : > { %v460_v25 = vstv %s2005_s11  ;;  %v550_v30 = vmul.f32 %v2028_v11, %v549_v22  ;;  %s299_s2 = sld [smem:[#allocation2 + %s298_s13]]  ;;  %s292_s10 = sadd.s32 26, %s1939_s17 }
  0x66   : > { %v461_v29 = vmul.f32 %v2037_v16, %v460_v25  ;;  %v720_v33 = vstv %s2008_s19  ;;  %s293_s11 = sld [smem:[#allocation2 + %s292_s10]]  ;;  %s306_s5 = sadd.s32 33, %s1939_s17 }
  0x67   : > { %v710_v32 = vstv %s2017_s1  ;;  %s307_s24 = sld [smem:[#allocation2 + %s306_s5]]  ;;  %s304_s28 = sadd.s32 32, %s1939_s17 }
  0x68   : > { %v466_v31 = vadd.f32 %v465_v17, %v461_v29  ;;  %v639_v37 = vstv %s2024_s12  ;;  %v2065_v41 = vmul.f32 %v2037_v16, %v710_v32  ;;  %s305_s6 = sld [smem:[#allocation2 + %s304_s28]]  ;;  %s300_s8 = sadd.s32 30, %s1939_s17 }
  0x69   : > { %v539_v36 = vstv %s2034_s23  ;;  %s302_s26 = sadd.s32 31, %s1939_s17  ;;  %s301_s30 = sld [smem:[#allocation2 + %s300_s8]]  ;;  %v640_v17 = vmul.f32 %v2028_v11, %v639_v37 }
  0x6a   : > { %v470_v34 = vmul.f32 %v2037_v16, %v466_v31  ;;  %v492_v35 = vstv %s295_s29  ;;  %v540_v43 = vmul.f32 %v2037_v16, %v539_v36  ;;  %s303_s0 = sld [smem:[#allocation2 + %s302_s26]]  ;;  %s296_s18 = sadd.s32 28, %s1939_s17 }
  0x6b   : > { %v493_v39 = vmul.f32 %v2037_v16, %v492_v35  ;;  %v520_v47 = vstv %s299_s2  ;;  %s297_s7 = sld [smem:[#allocation2 + %s296_s18]]  ;;  %s330_s3 = sadd.s32 45, %s1939_s17 }
  0x6c   : > { %v475_v38 = vadd.f32 %v474_v7, %v470_v34  ;;  %v545_v48 = vadd.f32 %v544_v13, %v540_v43  ;;  %v521_v50 = vmul.f32 %v2037_v16, %v520_v47  ;;  %v582_v57 = vstv %s293_s11  ;;  %s350_s4 = sadd.s32 55, %s1939_s17  ;;  %s331_s1 = sld [smem:[#allocation2 + %s330_s3]] }
  0x6d   : > { %v498_v42 = vadd.f32 %v497_v18, %v493_v39  ;;  %v583_v59 = vmul.f32 %v2037_v16, %v582_v57  ;;  %v610_v2 = vstv %s307_s24  ;;  %s351_s20 = sld [smem:[#allocation2 + %s350_s4]]  ;;  %s318_s25 = sadd.s32 39, %s1939_s17  ;;  %v721_v39 = vmul.f32 %v2028_v11, %v720_v33 }
  0x6e   : > { %v479_v40 = vmul.f32 %v2037_v16, %v475_v38  ;;  %v526_v52 = vadd.f32 %v525_v21, %v521_v50  ;;  %v554_v53 = vadd.f32 %v550_v30, %v545_v48  ;;  %v629_v13 = vstv %s305_s6  ;;  %s319_s15 = sld [smem:[#allocation2 + %s318_s25]]  ;;  %s312_s22 = sadd.s32 36, %s1939_s17 }
  0x6f   : > { %v502_v44 = vmul.f32 %v2037_v16, %v498_v42  ;;  %v588_v61 = vadd.f32 %v587_v23, %v583_v59  ;;  %v664_v22 = vstv %s301_s30  ;;  %v716_v38 = vadd.f32 %v715_v15, %v2065_v41  ;;  %s322_s9 = sadd.s32 41, %s1939_s17  ;;  %s334_s12 = sadd.s32 47, %s1939_s17 }
  0x70   : > { %v484_v45 = vadd.f32 %v483_v4, %v479_v40  ;;  %v530_v54 = vmul.f32 %v2037_v16, %v526_v52  ;;  %v558_v55 = vmul.f32 %v2028_v11, %v554_v53  ;;  %v683_v23 = vstv %s303_s0  ;;  %s2129_s19 = sld [smem:[#allocation2 + %s312_s22]]  ;;  %s362_s21 = sadd.s32 61, %s1939_s17 }
  0x71   : > { %v507_v46 = vadd.f32 %v506_v12, %v502_v44  ;;  %v592_v63 = vmul.f32 %v2037_v16, %v588_v61  ;;  %v665_v25 = vmul.f32 %v2037_v16, %v664_v22  ;;  %v684_v34 = vmul.f32 %v2037_v16, %v683_v23  ;;  %s2132_s23 = sld [smem:[#allocation2 + %s322_s9]]  ;;  %s340_s27 = sadd.s32 50, %s1939_s17 }
  0x72   : > { %v535_v56 = vadd.f32 %v534_v8, %v530_v54  ;;  %v2081_v0 = vmul.f32 %v2037_v16, %v484_v45  ;;  %v611_v8 = vmul.f32 %v2037_v16, %v610_v2  ;;  %v693_v35 = vstv %s297_s7  ;;  %s2136_s29 = sld [smem:[#allocation2 + %s334_s12]]  ;;  %s366_s13 = sadd.s32 63, %s1939_s17 }
  0x73   : > { %v511_v49 = vmul.f32 %v2037_v16, %v507_v46  ;;  %v597_v1 = vadd.f32 %v596_v14, %v592_v63  ;;  %v630_v14 = vmul.f32 %v2037_v16, %v629_v13  ;;  %v670_v29 = vadd.f32 %v669_v27, %v665_v25  ;;  %s363_s2 = sld [smem:[#allocation2 + %s362_s21]]  ;;  %s310_s5 = sadd.s32 35, %s1939_s17 }
  0x74   : > { %v562_v58 = vadd.f32 %v558_v55, %v535_v56  ;;  %v616_v12 = vadd.f32 %v615_v26, %v611_v8  ;;  %v689_v27 = vadd.f32 %v688_v24, %v684_v34  ;;  %v694_v36 = vmul.f32 %v2028_v11, %v693_v35  ;;  %s2140_s10 = sld [smem:[#allocation2 + %s340_s27]]  ;;  %s316_s24 = sadd.s32 38, %s1939_s17 }
  0x75   : > { %v516_v51 = vadd.f32 %v515_v5, %v511_v49  ;;  %v601_v5 = vmul.f32 %v2037_v16, %v597_v1  ;;  %v635_v20 = vadd.f32 %v634_v19, %v630_v14  ;;  %v674_v31 = vmul.f32 %v2037_v16, %v670_v29  ;;  %s367_s11 = sld [smem:[#allocation2 + %s366_s13]]  ;;  %s328_s28 = sadd.s32 44, %s1939_s17 }
  0x76   : > { %v566_v60 = vmul.f32 %v2028_v11, %v562_v58  ;;  %v620_v18 = vmul.f32 %v2037_v16, %v616_v12  ;;  %v698_v37 = vadd.f32 %v694_v36, %v689_v27  ;;  %v725_v42 = vadd.f32 %v721_v39, %v716_v38  ;;  %s2149_s6 = sld [smem:[#allocation2 + %s310_s5]]  ;;  %s358_s8 = sadd.s32 59, %s1939_s17 }
  0x77   : > { %v606_v7 = vadd.f32 %v605_v6, %v601_v5  ;;  %v644_v6 = vadd.f32 %v640_v17, %v635_v20  ;;  %v679_v19 = vadd.f32 %v678_v10, %v674_v31  ;;  %v766_v43 = vstv %s351_s20  ;;  %s2153_s26 = sld [smem:[#allocation2 + %s316_s24]]  ;;  %s348_s30 = sadd.s32 54, %s1939_s17 }
  0x78   : > { %v570_v62 = vadd.f32 %v566_v60, %v516_v51  ;;  %v625_v21 = vadd.f32 %v624_v9, %v620_v18  ;;  %v702_v10 = vmul.f32 %v2028_v11, %v698_v37  ;;  %v771_v24 = vstv %s331_s1  ;;  %s2157_s0 = scalar_lea.vmem [#allocation5], %s1933_s14   ;;  %s2161_s18 = sld [smem:[#allocation2 + %s328_s28]] }
  0x79   : > { %v648_v26 = vmul.f32 %v2028_v11, %v644_v6  ;;  %v734_v44 = vadd.f32 %v2052_v28, %v725_v42  ;;  %v767_v45 = vmul.f32 %v2037_v16, %v766_v43  ;;  %v780_v47 = vstv %s319_s15  ;;  %s359_s7 = sld [smem:[#allocation2 + %s358_s8]]  ;;  %s324_s3 = sadd.s32 42, %s1939_s17  ;;  %v2222_v42 = vld [vmem:[%s1936_s16 + $0x40] sm:$0xff] }
  0x7a   : > { %v2087_v4 = vmul.f32 %v2028_v11, %v570_v62  ;;  %v706_v40 = vadd.f32 %v702_v10, %v679_v19  ;;  %v789_v54 = vstv %s2129_s19  ;;  %v803_v55 = vstv %s2136_s29  ;;  %s349_s4 = sld [smem:[#allocation2 + %s348_s30]]  ;;  %s336_s14 = sadd.s32 48, %s1939_s17 }
  0x7b   : > { %v652_v30 = vadd.f32 %v648_v26, %v625_v21  ;;  %v738_v15 = vmul.f32 %v734_v44, %v2012_v3  ;;  %v772_v41 = vadd.f32 %v771_v24, %v767_v45  ;;  %v812_v58 = vstv %s2132_s23  ;;  %s360_s1 = sadd.s32 60, %s1939_s17  ;;  %s2171_s20 = sld [smem:[#allocation2 + %s324_s3]] }
  0x7c   : > { %v578_v48 = vadd.f32 %v2087_v4, %v2081_v0  ;;  %v826_v59 = vstv %s367_s11  ;;  %v831_v60 = vstv %s2140_s10  ;;  %s2173_s25 = sld [smem:[#allocation2 + %s336_s14]]  ;;  %v821_v5 = vstv %s2149_s6  ;;  %s308_s22 = sadd.s32 34, %s1939_s17 }
  0x7d   : > { %v656_v9 = vmul.f32 %v2028_v11, %v652_v30  ;;  %v742_v33 = vadd.f32 %v738_v15, %v706_v40  ;;  %v776_v46 = vmul.f32 %v2037_v16, %v772_v41  ;;  %v827_v62 = vmul.f32 %v2037_v16, %v826_v59  ;;  %s361_s15 = sld [smem:[#allocation2 + %s360_s1]]  ;;  %s320_s9 = sadd.s32 40, %s1939_s17 }
  0x7e   : > { %v850_v12 = vstv %s2161_s18  ;;  %s344_s12 = sadd.s32 52, %s1939_s17  ;;  %s2187_s19 = sld [smem:[#allocation2 + %s308_s22]] }
  0x7f   : > { %v660_v32 = vadd.f32 %v656_v9, %v606_v7  ;;  %v746_v28 = vmul.f32 %v742_v33, %v2012_v3  ;;  %v781_v50 = vadd.f32 %v780_v47, %v776_v46  ;;  %v832_v0 = vadd.f32 %v831_v60, %v827_v62  ;;  %s372_s21 = sadd.s32 66, %s1939_s17  ;;  %s2191_s23 = sld [smem:[#allocation2 + %s320_s9]] }
  0x80   : > { %v840_v7 = vstv %s2153_s26  ;;  %v845_v8 = vstv %s359_s7  ;;  %v855_v13 = vstv %s349_s4  ;;  %s374_s27 = sadd.s32 67, %s1939_s17  ;;  %s332_s29 = sadd.s32 46, %s1939_s17 }
  0x81   : > { %v750_v49 = vadd.f32 %v746_v28, %v660_v32  ;;  %v785_v53 = vmul.f32 %v2037_v16, %v781_v50  ;;  %v836_v2 = vmul.f32 %v2037_v16, %v832_v0  ;;  %v846_v18 = vmul.f32 %v2037_v16, %v845_v8  ;;  %s345_s13 = sld [smem:[#allocation2 + %s344_s12]]  ;;  %s356_s11 = sadd.s32 58, %s1939_s17 }
  0x82   : > { %v856_v20 = vmul.f32 %v2028_v11, %v855_v13  ;;  %v893_v22 = vstv %s2173_s25  ;;  %v902_v23 = vstv %s2171_s20  ;;  %s373_s10 = sld [smem:[#allocation2 + %s372_s21]]  ;;  %s368_s28 = sadd.s32 64, %s1939_s17 }
  0x83   : > { %v754_v51 = vmul.f32 %v750_v49, %v2012_v3  ;;  %v798_v3 = vstv %s363_s2  ;;  %v790_v57 = vadd.f32 %v789_v54, %v785_v53  ;;  %v841_v14 = vadd.f32 %v840_v7, %v836_v2  ;;  %s342_s2 = sadd.s32 51, %s1939_s17  ;;  %s375_s5 = sld [smem:[#allocation2 + %s374_s27]] }
  0x84   : > { %v799_v56 = vmul.f32 %v2037_v16, %v798_v3  ;;  %v851_v21 = vadd.f32 %v850_v12, %v846_v18  ;;  %v888_v6 = vstv %s361_s15  ;;  %s2199_s24 = sld [smem:[#allocation2 + %s332_s29]]  ;;  %v911_v27 = vstv %s2187_s19  ;;  %s314_s30 = sadd.s32 37, %s1939_s17 }
  0x85   : > { %v758_v52 = vadd.f32 %v754_v51, %v578_v48  ;;  %v889_v26 = vmul.f32 %v2037_v16, %v888_v6  ;;  %s2203_s6 = sld [smem:[#allocation2 + %s342_s2]]  ;;  %v2210_v35 = vmul.f32 %v2037_v16, %v790_v57  ;;  %v930_v39 = vstv %s2191_s23  ;;  %s338_s18 = sadd.s32 49, %s1939_s17 }
  0x86   : > { %v804_v61 = vadd.f32 %v803_v55, %v799_v56  ;;  %v860_v25 = vadd.f32 %v856_v20, %v851_v21  ;;  %s2205_s8 = sld [smem:[#allocation2 + %s356_s11]]  ;;  %s370_s7 = sadd.s32 65, %s1939_s17 }
  0x87   : > { %762 = vst [vmem:[%s2157_s0] sm:$0xff] %v758_v52  ;;  %v894_v30 = vadd.f32 %v893_v22, %v889_v26  ;;  %s2207_s26 = sld [smem:[#allocation2 + %s368_s28]]  ;;  %v921_v10 = vstv %s345_s13  ;;  %s364_s4 = sadd.s32 62, %s1939_s17 }
  0x88   : > { %v808_v63 = vmul.f32 %v2037_v16, %v804_v61  ;;  %v864_v29 = vmul.f32 %v2028_v11, %v860_v25  ;;  %v935_v40 = vstv %s373_s10  ;;  %s315_s3 = sld [smem:[#allocation2 + %s314_s30]]  ;;  %s326_s25 = sadd.s32 43, %s1939_s17 }
  0x89   : > { %v898_v9 = vmul.f32 %v2037_v16, %v894_v30  ;;  %v916_v38 = vstv %s375_s5  ;;  %v936_v24 = vmul.f32 %v2222_v42, %v935_v40  ;;  %s339_s14 = sld [smem:[#allocation2 + %s338_s18]]  ;;  %s354_s15 = sadd.s32 57, %s1939_s17 }
  0x8a   : > { %v813_v1 = vadd.f32 %v812_v58, %v808_v63  ;;  %v868_v31 = vadd.f32 %v864_v29, %v841_v14  ;;  %v917_v43 = vmul.f32 %v2222_v42, %v916_v38  ;;  %v940_v44 = vstv %s2199_s24  ;;  %s371_s1 = sld [smem:[#allocation2 + %s370_s7]]  ;;  %s346_s9 = sadd.s32 53, %s1939_s17 }
  0x8b   : > { %v903_v32 = vadd.f32 %v902_v23, %v898_v9  ;;  %v975_v41 = vstv %s2203_s6  ;;  %v941_v46 = vadd.f32 %v940_v44, %v936_v24  ;;  %s365_s20 = sld [smem:[#allocation2 + %s364_s4]]  ;;  %s352_s12 = sadd.s32 56, %s1939_s17 }
  0x8c   : > { %v817_v4 = vmul.f32 %v2037_v16, %v813_v1  ;;  %v872_v19 = vmul.f32 %v2028_v11, %v868_v31  ;;  %v2215_v11 = vld [vmem:[%s1936_s16 + $0x20] sm:$0xff]  ;;  %v945_v45 = vstv %s2205_s8  ;;  %s327_s22 = sld [smem:[#allocation2 + %s326_s25]]  ;;  %s418_s27 = sadd.s32 89, %s1939_s17 }
  0x8d   : > { %v907_v36 = vmul.f32 %v2037_v16, %v903_v32  ;;  %v922_v16 = vadd.f32 %v921_v10, %v917_v43  ;;  %v970_v15 = vstv %s2207_s26  ;;  %v946_v47 = vmul.f32 %v2215_v11, %v945_v45  ;;  %s355_s19 = sld [smem:[#allocation2 + %s354_s15]]  ;;  %s398_s29 = sadd.s32 79, %s1939_s17 }
  0x8e   : > { %v822_v17 = vadd.f32 %v821_v5, %v817_v4  ;;  %v971_v48 = vmul.f32 %v2222_v42, %v970_v15  ;;  %v984_v3 = vstv %s315_s3  ;;  %s347_s21 = sld [smem:[#allocation2 + %s346_s9]]  ;;  %s386_s10 = sadd.s32 73, %s1939_s17 }
  0x8f   : > { %v926_v33 = vmul.f32 %v2222_v42, %v922_v16  ;;  %v950_v49 = vadd.f32 %v946_v47, %v941_v46  ;;  %v912_v54 = vadd.f32 %v911_v27, %v907_v36  ;;  %s353_s23 = sld [smem:[#allocation2 + %s352_s12]]  ;;  %v994_v57 = vstv %s339_s14  ;;  %s402_s11 = sadd.s32 81, %s1939_s17 }
  0x90   : > { %v876_v34 = vadd.f32 %v872_v19, %v822_v17  ;;  %v976_v50 = vadd.f32 %v975_v41, %v971_v48  ;;  %v989_v55 = vstv %s371_s1  ;;  %s419_s13 = sld [smem:[#allocation2 + %s418_s27]]  ;;  %v2252_v17 = vld [vmem:[%s1936_s16] sm:$0xff]  ;;  %s430_s24 = sadd.s32 95, %s1939_s17 }
  0x91   : > { %v931_v28 = vadd.f32 %v930_v39, %v926_v33  ;;  %v954_v51 = vmul.f32 %v2215_v11, %v950_v49  ;;  %v999_v58 = vstv %s365_s20  ;;  %v990_v60 = vmul.f32 %v2222_v42, %v989_v55  ;;  %s399_s2 = sld [smem:[#allocation2 + %s398_s29]]  ;;  %s380_s28 = sadd.s32 70, %s1939_s17 }
  0x92   : > { %v2218_v37 = vmul.f32 %v2215_v11, %v876_v34  ;;  %v980_v52 = vmul.f32 %v2222_v42, %v976_v50  ;;  %v1000_v61 = vmul.f32 %v2215_v11, %v999_v58  ;;  %v1021_v0 = vstv %s327_s22  ;;  %s387_s5 = sld [smem:[#allocation2 + %s386_s10]]  ;;  %s434_s8 = sadd.s32 97, %s1939_s17 }
  0x93   : > { %v958_v53 = vadd.f32 %v954_v51, %v931_v28  ;;  %v995_v62 = vadd.f32 %v994_v57, %v990_v60  ;;  %v1016_v63 = vstv %s355_s19  ;;  %s2261_s6 = sld [smem:[#allocation2 + %s402_s11]]  ;;  %s408_s26 = sadd.s32 84, %s1939_s17 }
  0x94   : > { %v985_v59 = vadd.f32 %v984_v3, %v980_v52  ;;  %v1017_v2 = vmul.f32 %v2222_v42, %v1016_v63  ;;  %v1035_v7 = vstv %s347_s21  ;;  %v884_v29 = vadd.f32 %v2218_v37, %v2210_v35  ;;  %s431_s30 = sld [smem:[#allocation2 + %s430_s24]]  ;;  %s378_s3 = sadd.s32 69, %s1939_s17 }
  0x95   : > { %v962_v56 = vmul.f32 %v2215_v11, %v958_v53  ;;  %v1004_v1 = vadd.f32 %v1000_v61, %v995_v62  ;;  %v1026_v5 = vstv %s353_s23  ;;  %v1036_v14 = vmul.f32 %v2252_v17, %v1035_v7  ;;  %s2268_s18 = sld [smem:[#allocation2 + %s380_s28]]  ;;  %s390_s14 = sadd.s32 75, %s1939_s17 }
  0x96   : > { %v1022_v8 = vadd.f32 %v1021_v0, %v1017_v2  ;;  %v1027_v13 = vmul.f32 %v2215_v11, %v1026_v5  ;;  %v1073_v20 = vstv %s419_s13  ;;  %s2270_s7 = sld [smem:[#allocation2 + %s434_s8]]  ;;  %s384_s1 = sadd.s32 72, %s1939_s17 }
  0x97   : > { %v1008_v4 = vmul.f32 %v2215_v11, %v1004_v1  ;;  %v966_v6 = vadd.f32 %v962_v56, %v912_v54  ;;  %v1074_v22 = vmul.f32 %v2222_v42, %v1073_v20  ;;  %v1078_v23 = vstv %s399_s2  ;;  %s2273_s4 = sld [smem:[#allocation2 + %s408_s26]]  ;;  %s426_s25 = sadd.s32 93, %s1939_s17 }
  0x98   : > { %v1031_v18 = vadd.f32 %v1027_v13, %v1022_v8  ;;  %v1087_v34 = vstv %s387_s5  ;;  %s2279_s20 = sld [smem:[#allocation2 + %s378_s3]]  ;;  %s396_s22 = sadd.s32 78, %s1939_s17 }
  0x99   : > { %v1012_v12 = vadd.f32 %v1008_v4, %v985_v59  ;;  %v1079_v30 = vadd.f32 %v1078_v23, %v1074_v22  ;;  %s2282_s15 = sld [smem:[#allocation2 + %s390_s14]]  ;;  %s404_s12 = sadd.s32 82, %s1939_s17  ;;  %v1110_v37 = vstv %s2261_s6 }
  0x9a   : > { %v1040_v21 = vadd.f32 %v1036_v14, %v1031_v18  ;;  %s385_s9 = sld [smem:[#allocation2 + %s384_s1]]  ;;  %v1105_v36 = vstv %s431_s30  ;;  %s416_s19 = sadd.s32 88, %s1939_s17 }
  0x9b   : > { %v1083_v19 = vmul.f32 %v2222_v42, %v1079_v30  ;;  %s427_s21 = sld [smem:[#allocation2 + %s426_s25]]  ;;  %v1106_v38 = vmul.f32 %v2222_v42, %v1105_v36  ;;  %s428_s27 = sadd.s32 94, %s1939_s17  ;;  %v1096_v10 = vstv %s2268_s18 }
  0x9c   : > { %v1044_v25 = vmul.f32 %v2252_v17, %v1040_v21  ;;  %s397_s23 = sld [smem:[#allocation2 + %s396_s22]]  ;;  %v1133_v39 = vstv %s2270_s7  ;;  %s392_s10 = sadd.s32 76, %s1939_s17 }
  0x9d   : > { %v1088_v27 = vadd.f32 %v1087_v34, %v1083_v19  ;;  %s2293_s29 = sld [smem:[#allocation2 + %s404_s12]]  ;;  %v1111_v40 = vadd.f32 %v1110_v37, %v1106_v38  ;;  %v1138_v43 = vstv %s2273_s4  ;;  %v1134_v24 = vmul.f32 %v2222_v42, %v1133_v39  ;;  %s376_s11 = sadd.s32 68, %s1939_s17 }
  0x9e   : > { %v1048_v26 = vadd.f32 %v1044_v25, %v1012_v12  ;;  %s417_s13 = sld [smem:[#allocation2 + %s416_s19]]  ;;  %v1128_v28 = vstv %s2279_s20  ;;  %s442_s24 = sadd.s32 101, %s1939_s17 }
  0x9f   : > { %s429_s2 = sld [smem:[#allocation2 + %s428_s27]]  ;;  %v1092_v16 = vmul.f32 %v2222_v42, %v1088_v27  ;;  %v1115_v44 = vmul.f32 %v2222_v42, %v1111_v40  ;;  %v1139_v45 = vadd.f32 %v1138_v43, %v1134_v24  ;;  %v1119_v15 = vstv %s2282_s15  ;;  %s412_s28 = sadd.s32 86, %s1939_s17 }
  0xa0   : > { %v1052_v31 = vmul.f32 %v2252_v17, %v1048_v26  ;;  %v1147_v33 = vstv %s385_s9  ;;  %s393_s5 = sld [smem:[#allocation2 + %s392_s10]]  ;;  %s400_s8 = sadd.s32 80, %s1939_s17 }
  0xa1   : > { %v1143_v41 = vmul.f32 %v2222_v42, %v1139_v45  ;;  %v1097_v46 = vadd.f32 %v1096_v10, %v1092_v16  ;;  %v1152_v47 = vstv %s427_s21  ;;  %v1120_v48 = vadd.f32 %v1119_v15, %v1115_v44  ;;  %s2310_s6 = sld [smem:[#allocation2 + %s376_s11]]  ;;  %s440_s18 = sadd.s32 100, %s1939_s17 }
  0xa2   : > { %v1056_v9 = vadd.f32 %v1052_v31, %v966_v6  ;;  %v1153_v50 = vmul.f32 %v2222_v42, %v1152_v47  ;;  %v1157_v51 = vstv %s397_s23  ;;  %s443_s26 = sld [smem:[#allocation2 + %s442_s24]]  ;;  %s388_s7 = sadd.s32 74, %s1939_s17 }
  0xa3   : > { %v1148_v49 = vadd.f32 %v1147_v33, %v1143_v41  ;;  %v1200_v54 = vstv %s2293_s29  ;;  %v1124_v58 = vmul.f32 %v2222_v42, %v1120_v48  ;;  %s413_s30 = sld [smem:[#allocation2 + %s412_s28]]  ;;  %v2320_v62 = vmul.f32 %v2222_v42, %v1097_v46  ;;  %s424_s4 = sadd.s32 92, %s1939_s17 }
  0xa4   : > { %v1060_v32 = vmul.f32 %v2252_v17, %v1056_v9  ;;  %v1162_v52 = vstv %s417_s13  ;;  %v1158_v3 = vadd.f32 %v1157_v51, %v1153_v50  ;;  %s2317_s3 = sld [smem:[#allocation2 + %s400_s8]]  ;;  %s410_s20 = sadd.s32 85, %s1939_s17 }
  0xa5   : > { %v1195_v53 = vstv %s429_s2  ;;  %v1163_v55 = vmul.f32 %v2215_v11, %v1162_v52  ;;  %s441_s14 = sld [smem:[#allocation2 + %s440_s18]]  ;;  %v1129_v63 = vadd.f32 %v1128_v28, %v1124_v58  ;;  %s436_s15 = sadd.s32 98, %s1939_s17 }
  0xa6   : > { %v1064_v35 = vadd.f32 %v1060_v32, %v884_v29  ;;  %v1196_v56 = vmul.f32 %v2222_v42, %v1195_v53  ;;  %v1209_v1 = vstv %s393_s5  ;;  %s2324_s1 = sld [smem:[#allocation2 + %s388_s7]]  ;;  %s382_s12 = sadd.s32 71, %s1939_s17 }
  0xa7   : > { %v1167_v57 = vadd.f32 %v1163_v55, %v1158_v3  ;;  %s425_s25 = sld [smem:[#allocation2 + %s424_s4]]  ;;  %v1218_v7 = vstv %s2310_s6  ;;  %s438_s19 = sadd.s32 99, %s1939_s17  ;;  %v1739_v3 = vld [vmem:[%s1936_s16 + $0x20] sm:$0xff] }
  0xa8   : > { %1595 = vst [vmem:[%s2157_s0 + $0x20] sm:$0xff] %v1064_v35  ;;  %v1201_v60 = vadd.f32 %v1200_v54, %v1196_v56  ;;  %v1223_v5 = vstv %s443_s26  ;;  %s2330_s22 = sld [smem:[#allocation2 + %s410_s20]]  ;;  %s394_s21 = sadd.s32 77, %s1939_s17 }
  0xa9   : > { %v1171_v59 = vmul.f32 %v2215_v11, %v1167_v57  ;;  %v1228_v8 = vstv %s413_s30  ;;  %s437_s9 = sld [smem:[#allocation2 + %s436_s15]]  ;;  %v1224_v13 = vmul.f32 %v2222_v42, %v1223_v5  ;;  %s406_s27 = sadd.s32 83, %s1939_s17 }
  0xaa   : > { %v1205_v0 = vmul.f32 %v2222_v42, %v1201_v60  ;;  %v1247_v20 = vstv %s2317_s3  ;;  %s2341_s23 = sld [smem:[#allocation2 + %s382_s12]]  ;;  %s422_s29 = sadd.s32 91, %s1939_s17 }
  0xab   : > { %v1175_v61 = vadd.f32 %v1171_v59, %v1148_v49  ;;  %v1242_v18 = vstv %s441_s14  ;;  %v1229_v21 = vadd.f32 %v1228_v8, %v1224_v13  ;;  %s439_s13 = sld [smem:[#allocation2 + %s438_s19]]  ;;  %s432_s10 = sadd.s32 96, %s1939_s17 }
  0xac   : > { %v1210_v4 = vadd.f32 %v1209_v1, %v1205_v0  ;;  %v1243_v6 = vmul.f32 %v2222_v42, %v1242_v18  ;;  %v1237_v23 = vstv %s2324_s1  ;;  %s2346_s2 = sld [smem:[#allocation2 + %s394_s21]]  ;;  %s414_s28 = sadd.s32 87, %s1939_s17 }
  0xad   : > { %v1179_v2 = vmul.f32 %v2215_v11, %v1175_v61  ;;  %v1233_v22 = vmul.f32 %v2222_v42, %v1229_v21  ;;  %v1252_v25 = vstv %s425_s25  ;;  %s407_s11 = sld [smem:[#allocation2 + %s406_s27]]  ;;  %s420_s6 = sadd.s32 90, %s1939_s17 }
  0xae   : > { %v1214_v14 = vmul.f32 %v2222_v42, %v1210_v4  ;;  %v1248_v26 = vadd.f32 %v1247_v20, %v1243_v6  ;;  %v1253_v29 = vmul.f32 %v2215_v11, %v1252_v25  ;;  %v1282_v9 = vstv %s2330_s22  ;;  %s423_s5 = sld [smem:[#allocation2 + %s422_s29]] }
  0xaf   : > { %v1183_v12 = vadd.f32 %v1179_v2, %v1129_v63  ;;  %v1238_v30 = vadd.f32 %v1237_v23, %v1233_v22  ;;  %v1277_v31 = vstv %s437_s9  ;;  %s433_s24 = sld [smem:[#allocation2 + %s432_s10]] }
  0xb0   : > { %v1257_v19 = vadd.f32 %v1253_v29, %v1248_v26  ;;  %v1278_v32 = vmul.f32 %v2222_v42, %v1277_v31  ;;  %v1219_v36 = vadd.f32 %v1218_v7, %v1214_v14  ;;  %v1291_v37 = vstv %s2341_s23  ;;  %s415_s8 = sld [smem:[#allocation2 + %s414_s28]] }
  0xb1   : > { %v1296_v38 = vstv %s439_s13  ;;  %s421_s26 = sld [smem:[#allocation2 + %s420_s6]]  ;;  %v1187_v55 = vmul.f32 %v1739_v3, %v1183_v12 }
  0xb2   : > { %v1261_v34 = vmul.f32 %v2215_v11, %v1257_v19  ;;  %v1283_v35 = vadd.f32 %v1282_v9, %v1278_v32  ;;  %v1297_v40 = vmul.f32 %v2222_v42, %v1296_v38  ;;  %v1328_v44 = vstv %s2346_s2  ;;  %s2419_s17 = sld [smem:[#allocation12_spill]] }
  0xb3   : > { %v1301_v43 = vstv %s407_s11  ;;  %v1191_v59 = vadd.f32 %v1187_v55, %v2320_v62 }
  0xb4   : > { %v1265_v27 = vadd.f32 %v1261_v34, %v1238_v30  ;;  %v1287_v10 = vmul.f32 %v2222_v42, %v1283_v35  ;;  %v1323_v16 = vstv %s423_s5  ;;  %v1302_v45 = vadd.f32 %v1301_v43, %v1297_v40 }
  0xb5   : > { %v1306_v24 = vstv %s433_s24  ;;  %v1324_v41 = vmul.f32 %v2222_v42, %v1323_v16 }
  0xb6   : > { %v1269_v39 = vmul.f32 %v2215_v11, %v1265_v27  ;;  %v1307_v15 = vmul.f32 %v2215_v11, %v1306_v24  ;;  %v1292_v46 = vadd.f32 %v1291_v37, %v1287_v10  ;;  %v1342_v48 = vstv %s415_s8 }
  0xb7   : > { %v1329_v28 = vadd.f32 %v1328_v44, %v1324_v41  ;;  %v1333_v47 = vstv %s421_s26  ;;  %v1343_v51 = vmul.f32 %v2252_v17, %v1342_v48 }
  0xb8   : > { %v1311_v33 = vadd.f32 %v1307_v15, %v1302_v45  ;;  %v1334_v50 = vmul.f32 %v2215_v11, %v1333_v47  ;;  %v1273_v42 = vadd.f32 %v1269_v39, %v1219_v36  ;;  %p2420_p7 = scmp.ne.s32.totalorder %s2419_s17, 0 }
  0xb9   : > { %s2421_s30 = sld [smem:[#allocation8_spill]] (%p2420_p7)  ;;  %s1835_s14 = smov (%p2420_p7), 0  }
  0xba   : > { %v1315_v49 = vmul.f32 %v2215_v11, %v1311_v33  ;;  %v1338_v52 = vadd.f32 %v1334_v50, %v1329_v28  ;;  %s2422_s3 = sld [smem:[#allocation16_spill]] (%p2420_p7) }
  0xbc   : > { %v1319_v53 = vadd.f32 %v1315_v49, %v1292_v46  ;;  %v1347_v54 = vadd.f32 %v1343_v51, %v1338_v52 }
  0xbe   : > { %v1351_v56 = vmul.f32 %v2252_v17, %v1347_v54 }
  0xbf   : > { %s1611_s18 = smul.u32 (%p2420_p7), 6, %s2421_s30 }
  0xc0   : > { %v1355_v57 = vadd.f32 %v1351_v56, %v1319_v53 }
  0xc1   : > { %s1394_s4 = scalar_lea.vmem (%p2420_p7), %s2422_s3, %s1611_s18  }
  0xc2   : > { %v1359_v58 = vmul.f32 %v2252_v17, %v1355_v57 }
  0xc4   : > { %v1363_v60 = vadd.f32 %v1359_v58, %v1273_v42 }
  0xc6   : > { %v1367_v61 = vmul.f32 %v2252_v17, %v1363_v60  ;;  %1386 = sbr.rel (!%p2420_p7) target bundleno = 211 (0xd3), region = 70 }
  0xc8   : > { %v1371_v63 = vadd.f32 %v1367_v61, %v1191_v59 }
  0xca   : > { %1599 = vst [vmem:[%s2157_s0 + $0x40] sm:$0xff] %v1371_v63 }
  0xcb LB: >> { %v1413_v11 = vld [vmem:[%s2157_s0] sm:$0x3]  ;;  %s1407_s14 = sadd.s32 1, %s1837_s14   ;;  %s1837_s14 = sphi %s1835_s14, %s1407_s14  }
  0xcc   : >> { %v1415_v17 = vld [vmem:[%s2157_s0 + $0x20] sm:$0x3]  ;;  %1414 = vst [vmem:[%s1394_s4] sm:$0x3] %v1413_v11  ;;  %p1406_p9 = scmp.ge.s32.totalorder %s1407_s14, 1 }
  0xcd   : >> { %1416 = vst [vmem:[%s1394_s4 + $0x2] sm:$0x3] %v1415_v17 }
  0xce   : > { %1409 = sbr.rel (!%p1406_p9) target bundleno = 203 (0xcb), region = 151 }
  0xd1   : >> { %v1417_v62 = vld [vmem:[%s2157_s0 + $0x40] sm:$0x3] }
  0xd2   : >> { %1418 = vst [vmem:[%s1394_s4 + $0x4] sm:$0x3] %v1417_v62 }
  0xd3 PF: > { %s2423_s1 = sld [smem:[#allocation10_spill]] }
  0xd4   : > { %s2424_s9 = sld [smem:[#allocation7_spill]] }
  0xd5   : > { %s2425_s10 = sld [smem:[#allocation13_spill]] }
  0xd6   : > { %s2426_s11 = sld [smem:[#allocation9_spill]] }
  0xd7   : > { %s2427_s12 = sld [smem:[#allocation11_spill]] }
  0xd9   : > { %s13_s13 = sadd.s32 1, %s2423_s1  }
  0xda   : > { %p10_p10 = scmp.ge.s32.totalorder %s13_s13, 4  }
  0xdc   :  { %12 = sbr.rel (!%p10_p10) target bundleno = 7 (0x7), region = 162 }
  0xe1   :  { %1465 = vsyncpa [#allocation3], 1 }
  0xe2   :  { %1467 = vsyncpa [#allocation3 + $0x1], 1 }

</bundles_post_ra>
